<compile_context>
chip_gen: v6e
topology: v6e:2x2x1
jax: 0.10.0
libtpu: 0.0.40
codegen_flags: <defaults>
</compile_context>

<pallas_src>
import functools

import numpy as np
import jax
import jax.numpy as jnp
from jax.experimental import pallas as pl
from jax.experimental.pallas import tpu as pltpu


def _window_sum_rows(a, win, out_rows):
    """Sum of `win` consecutive rows along axis 1 via a binary-doubling tree.

    a: (n, R, C);  returns (n, out_rows, C) with out[:, i, :] = sum_k a[:, i+k, :].
    Uses floor(log2 win) + popcount(win) - 1 adds (4 for win=7) instead of win-1.
    """
    pow_sums = {1: a}
    p = 1
    while 2 * p <= win:
        cur = pow_sums[p]
        rows = cur.shape[1] - p
        pow_sums[2 * p] = cur[:, :rows, :] + cur[:, p:p + rows, :]
        p *= 2
    acc = None
    offset = 0
    rem = win
    bit = p
    while bit >= 1:
        if rem >= bit:
            piece = pow_sums[bit][:, offset:offset + out_rows, :]
            acc = piece if acc is None else acc + piece
            offset += bit
            rem -= bit
        bit //= 2
    return acc


def _box_filter(a, band_c, win, out_rows):
    """Valid box mean: MXU banded matmul along W (norm folded into band), then
    shifted-add tree along H.  a: (tn, H, cwin) f32, band_c: (cwin, cw) f32."""
    tn, H, cwin = a.shape
    cw = band_c.shape[1]
    aw = jnp.dot(a.reshape(tn * H, cwin), band_c,
                 preferred_element_type=jnp.float32).reshape(tn, H, cw)
    return _window_sum_rows(aw, win, out_rows)


def _ssim_kernel(band_ref, pred_ref, targ_ref, out_ref, *, win, Hc, Wc, chunk):
    """Per-image SSIM for one tile of images.

    band_ref : (chunk+win-1, chunk) f32 banded box filter (scaled by 1/win^2)
    pred_ref : (TN, H, W) float
    targ_ref : (TN, H, W) float
    out_ref  : (TN, 1)    f32 per-image mean SSIM
    """
    tn, H, _ = pred_ref.shape
    npix = float(win * win)
    cov_norm = npix / (npix - 1.0)            # use_sample_covariance=True
    two_cov = 2.0 * cov_norm
    c1 = 0.01 ** 2                             # (K1 * data_range)^2, data_range=1
    c2 = 0.03 ** 2

    x = pred_ref[...].astype(jnp.float32)
    y = targ_ref[...].astype(jnp.float32)
    band = band_ref[...]

    acc = jnp.zeros((tn, 1), jnp.float32)
    for j0 in range(0, Wc, chunk):             # static chunk loop over output cols
        cw = min(chunk, Wc - j0)
        cwin = cw + win - 1
        band_c = band[:cwin, :cw]
        xs = x[:, :, j0:j0 + cwin]
        ys = y[:, :, j0:j0 + cwin]

        # 4 fused statistics (vx and vy only appear as vx+vy -> filter x^2+y^2).
        ux = _box_filter(xs, band_c, win, Hc)
        uy = _box_filter(ys, band_c, win, Hc)
        uxxyy = _box_filter(xs * xs + ys * ys, band_c, win, Hc)
        uxy = _box_filter(xs * ys, band_c, win, Hc)

        pxy = ux * uy
        sq = ux * ux + uy * uy
        a1 = 2.0 * pxy + c1
        b1 = sq + c1
        a2 = two_cov * (uxy - pxy) + c2        # 2*vxy + c2
        b2 = cov_norm * (uxxyy - sq) + c2      # vx + vy + c2
        num = a1 * a2
        den = b1 * b2
        r = pl.reciprocal(den, approx=True)    # EUP slot instead of VALU divide
        r = r * (2.0 - den * r)                # one Newton step -> ~f32 accuracy
        s = num * r                            # (tn, Hc, cw)

        acc = acc + jnp.sum(jnp.sum(s, axis=2), axis=1, keepdims=True)

    out_ref[...] = acc * (1.0 / float(Hc * Wc))


def _vmem_capacity_bytes():
    try:
        cap = getattr(pltpu.get_tpu_info(), "vmem_capacity_bytes", None)
        if cap:
            return int(cap)
    except Exception:
        pass
    return 64 * 1024 * 1024                    # conservative (v7x per-TensorCore)


def ssim_pallas(predicted, target, win_size=7):
    """Pallas equivalent of the PyTorch SSIM module's forward pass."""
    p = jnp.asarray(predicted)
    t = jnp.asarray(target)
    # Half-precision inputs stay in native dtype for HBM traffic (compute is f32);
    # note: this can shift the result vs. a float64 skimage reference.
    if p.dtype not in (jnp.float32, jnp.bfloat16, jnp.float16):
        p = p.astype(jnp.float32)
    if t.dtype not in (jnp.float32, jnp.bfloat16, jnp.float16):
        t = t.astype(jnp.float32)

    if p.ndim == 4:
        B, C, H0, W = p.shape
        p = p.reshape(B * C, H0, W)
        t = t.reshape(B * C, H0, W)
    elif p.ndim == 3:
        pass
    elif p.ndim == 2:
        p = p[None]
        t = t[None]
    else:
        raise ValueError(
            "Unsupported input shape. Expected shapes are [batch, channels, H, W], "
            "[channels, H, W], or [H, W]."
        )

    if win_size % 2 != 1:
        raise ValueError("win_size must be odd (skimage rejects even windows).")
    N, H0, W = p.shape
    if min(H0, W) < win_size:
        raise ValueError("win_size exceeds image size (skimage raises in this case).")

    Hc = H0 - win_size + 1
    Wc = W - win_size + 1
    H = -(-H0 // 8) * 8                        # pad H so in-kernel reshapes stay views

    # --- banded box-filter matrix (1/win^2 folded in), built once on the host.
    CW = min(256, Wc)                          # MXU output-column chunk width
    cwin_max = CW + win_size - 1
    r = np.arange(cwin_max)[:, None]
    c = np.arange(CW)[None, :]
    band = (((c <= r) & (r < c + win_size)).astype(np.float32)
            / float(win_size * win_size))
    band = jnp.asarray(band)

    # --- tile-size / VMEM heuristics.
    in_bytes = int(np.dtype(p.dtype).itemsize)
    # per-image f32 working set inside the kernel + double-buffered input DMA
    work_img = 4 * (2 * H * W + 12 * H * cwin_max) + 2 * 2 * H * W * in_bytes
    vmem_cap = _vmem_capacity_bytes()
    vmem_limit = min(int(vmem_cap * 3 // 4), 96 * 1024 * 1024)
    budget = vmem_limit // 2
    tn_budget = max(8, (budget // max(work_img, 1)) // 8 * 8)

    n_round8 = -(-N // 8) * 8
    if n_round8 >= 32:
        # keep >= 4 grid steps: DMA/compute overlap + both v7x TensorCores busy
        tn_steps = max(8, ((n_round8 // 4) // 8) * 8)
    else:
        tn_steps = n_round8
    tn = int(max(8, min(tn_budget, tn_steps, 512)))

    if 8 * work_img > budget:
        # TODO(synk): very large images need spatial (H) tiling with a (win-1)-row
        # halo; for now just raise the VMEM limit toward the physical capacity.
        vmem_limit = int(min(vmem_cap, max(vmem_limit, 8 * work_img + (8 << 20))))

    n_pad = -(-N // tn) * tn
    pad_n = n_pad - N
    pad_h = H - H0
    if pad_n or pad_h:
        # zero-padded images give SSIM=1 but are excluded below; padded rows are
        # never covered by a valid window of the original image.
        p = jnp.pad(p, ((0, pad_n), (0, pad_h), (0, 0)))
        t = jnp.pad(t, ((0, pad_n), (0, pad_h), (0, 0)))

    kern = functools.partial(_ssim_kernel, win=win_size, Hc=Hc, Wc=Wc, chunk=CW)

    per_image = pl.pallas_call(
        kern,
        out_shape=jax.ShapeDtypeStruct((n_pad, 1), jnp.float32),
        grid=(n_pad // tn,),
        in_specs=[
            pl.BlockSpec((cwin_max, CW), lambda i: (0, 0)),   # band (constant block)
            pl.BlockSpec((tn, H, W), lambda i: (i, 0, 0)),
            pl.BlockSpec((tn, H, W), lambda i: (i, 0, 0)),
        ],
        out_specs=pl.BlockSpec((tn, 1), lambda i: (i, 0)),
        compiler_params=pltpu.CompilerParams(
            dimension_semantics=("parallel",),
            vmem_limit_bytes=int(vmem_limit),
        ),
    )(band, p, t)

    # Mean over all (batch, channel) SSIM values — same as np.mean(ssim_values).
    return jnp.mean(per_image[:N, 0])


def _ssim_reference_np(pred, targ, win):
    """Pure NumPy reference reproducing skimage ssim(win_size=win, data_range=1)."""
    B, C, H, W = pred.shape
    pad = (win - 1) // 2
    npix = win * win
    cov_norm = npix / (npix - 1)
    c1, c2 = 0.01 ** 2, 0.03 ** 2
    vals = []
    for b in range(B):
        for c in range(C):
            x = pred[b, c].astype(np.float64)
            y = targ[b, c].astype(np.float64)

            def box(a):
                out = np.zeros((H - 2 * pad, W - 2 * pad))
                for i in range(out.shape[0]):
                    for j in range(out.shape[1]):
                        out[i, j] = a[i:i + win, j:j + win].mean()
                return out

            ux, uy = box(x), box(y)
            uxx, uyy, uxy = box(x * x), box(y * y), box(x * y)
            vx = cov_norm * (uxx - ux * ux)
            vy = cov_norm * (uyy - uy * uy)
            vxy = cov_norm * (uxy - ux * uy)
            s = ((2 * ux * uy + c1) * (2 * vxy + c2)) / \
                ((ux * ux + uy * uy + c1) * (vx + vy + c2))
            vals.append(s.mean())
    return float(np.mean(vals))


if __name__ == "__main__":
    key = jax.random.PRNGKey(0)
    k1, k2 = jax.random.split(key)
    # batch=2, channels=4, spatial=16x16, values in [0, 1] (data_range=1.0)
    pred = jax.random.uniform(k1, (2, 4, 16, 16), dtype=jnp.float32)
    targ = jax.random.uniform(k2, (2, 4, 16, 16), dtype=jnp.float32)

    out = ssim_pallas(pred, targ, win_size=7)
    out = jax.block_until_ready(out)

    ref = _ssim_reference_np(np.asarray(pred), np.asarray(targ), 7)
    assert np.allclose(float(out), ref, atol=1e-4), (float(out), ref)

    print("KERNEL_OK")
</pallas_src>

<mosaic_0001>
module attributes {stable_mosaic.version = 11 : i64} {
  func.func @_ssim_kernel(%arg0: i32, %arg1: memref<16x10xf32, #tpu.memory_space<vmem>>, %arg2: memref<8x16x16xf32, #tpu.memory_space<vmem>>, %arg3: memref<8x16x16xf32, #tpu.memory_space<vmem>>, %arg4: memref<8x1xf32, #tpu.memory_space<vmem>>) attributes {dimension_semantics = [#tpu.dimension_semantics<parallel>], iteration_bounds = array<i64: 1>, scalar_prefetch = 0 : i64, scratch_operands = 0 : i64, tpu.core_type = #tpu.core_type<tc>, window_params = [{pipeline_mode = #tpu.pipeline_mode<synchronous>, transform_indices = @transform_0, window_bounds = array<i64: 16, 10>}, {transform_indices = @transform_1, window_bounds = array<i64: 8, 16, 16>}, {transform_indices = @transform_2, window_bounds = array<i64: 8, 16, 16>}, {transform_indices = @transform_3, window_bounds = array<i64: 8, 1>}]} {
    %c0 = arith.constant 0 : index
    %c0_0 = arith.constant 0 : index
    %c0_1 = arith.constant 0 : index
    %0 = vector.load %arg2[%c0, %c0_0, %c0_1] : memref<8x16x16xf32, #tpu.memory_space<vmem>>, vector<8x16x16xf32>
    %c0_2 = arith.constant 0 : index
    %c0_3 = arith.constant 0 : index
    %c0_4 = arith.constant 0 : index
    %1 = vector.load %arg3[%c0_2, %c0_3, %c0_4] : memref<8x16x16xf32, #tpu.memory_space<vmem>>, vector<8x16x16xf32>
    %c0_5 = arith.constant 0 : index
    %c0_6 = arith.constant 0 : index
    %2 = vector.load %arg1[%c0_5, %c0_6] : memref<16x10xf32, #tpu.memory_space<vmem>>, vector<16x10xf32>
    %cst = arith.constant 0.000000e+00 : f32
    %3 = vector.broadcast %cst : f32 to vector<8x1xf32>
    %4 = vector.shape_cast %0 : vector<8x16x16xf32> to vector<128x16xf32>
    %cst_7 = arith.constant dense<0.000000e+00> : vector<128x10xf32>
    %5 = tpu.matmul %4, %2, %cst_7 {dimension_numbers = #tpu.dot_dimension_numbers<[1], [0], [0], [1], [0, 0, 1, 1], [], []>} : vector<128x16xf32>, vector<16x10xf32>, vector<128x10xf32> -> vector<128x10xf32>
    %6 = vector.shape_cast %5 : vector<128x10xf32> to vector<8x16x10xf32>
    %7 = vector.extract_strided_slice %6 {offsets = [0, 0, 0], sizes = [8, 15, 10], strides = [1, 1, 1]} : vector<8x16x10xf32> to vector<8x15x10xf32>
    %8 = vector.extract_strided_slice %6 {offsets = [0, 1, 0], sizes = [8, 15, 10], strides = [1, 1, 1]} : vector<8x16x10xf32> to vector<8x15x10xf32>
    %9 = arith.addf %7, %8 : vector<8x15x10xf32>
    %10 = vector.extract_strided_slice %9 {offsets = [0, 0, 0], sizes = [8, 13, 10], strides = [1, 1, 1]} : vector<8x15x10xf32> to vector<8x13x10xf32>
    %11 = vector.extract_strided_slice %9 {offsets = [0, 2, 0], sizes = [8, 13, 10], strides = [1, 1, 1]} : vector<8x15x10xf32> to vector<8x13x10xf32>
    %12 = arith.addf %10, %11 : vector<8x13x10xf32>
    %13 = vector.extract_strided_slice %12 {offsets = [0, 0, 0], sizes = [8, 10, 10], strides = [1, 1, 1]} : vector<8x13x10xf32> to vector<8x10x10xf32>
    %14 = vector.extract_strided_slice %9 {offsets = [0, 4, 0], sizes = [8, 10, 10], strides = [1, 1, 1]} : vector<8x15x10xf32> to vector<8x10x10xf32>
    %15 = arith.addf %13, %14 : vector<8x10x10xf32>
    %16 = vector.extract_strided_slice %6 {offsets = [0, 6, 0], sizes = [8, 10, 10], strides = [1, 1, 1]} : vector<8x16x10xf32> to vector<8x10x10xf32>
    %17 = arith.addf %15, %16 : vector<8x10x10xf32>
    %18 = vector.shape_cast %1 : vector<8x16x16xf32> to vector<128x16xf32>
    %cst_8 = arith.constant dense<0.000000e+00> : vector<128x10xf32>
    %19 = tpu.matmul %18, %2, %cst_8 {dimension_numbers = #tpu.dot_dimension_numbers<[1], [0], [0], [1], [0, 0, 1, 1], [], []>} : vector<128x16xf32>, vector<16x10xf32>, vector<128x10xf32> -> vector<128x10xf32>
    %20 = vector.shape_cast %19 : vector<128x10xf32> to vector<8x16x10xf32>
    %21 = vector.extract_strided_slice %20 {offsets = [0, 0, 0], sizes = [8, 15, 10], strides = [1, 1, 1]} : vector<8x16x10xf32> to vector<8x15x10xf32>
    %22 = vector.extract_strided_slice %20 {offsets = [0, 1, 0], sizes = [8, 15, 10], strides = [1, 1, 1]} : vector<8x16x10xf32> to vector<8x15x10xf32>
    %23 = arith.addf %21, %22 : vector<8x15x10xf32>
    %24 = vector.extract_strided_slice %23 {offsets = [0, 0, 0], sizes = [8, 13, 10], strides = [1, 1, 1]} : vector<8x15x10xf32> to vector<8x13x10xf32>
    %25 = vector.extract_strided_slice %23 {offsets = [0, 2, 0], sizes = [8, 13, 10], strides = [1, 1, 1]} : vector<8x15x10xf32> to vector<8x13x10xf32>
    %26 = arith.addf %24, %25 : vector<8x13x10xf32>
    %27 = vector.extract_strided_slice %26 {offsets = [0, 0, 0], sizes = [8, 10, 10], strides = [1, 1, 1]} : vector<8x13x10xf32> to vector<8x10x10xf32>
    %28 = vector.extract_strided_slice %23 {offsets = [0, 4, 0], sizes = [8, 10, 10], strides = [1, 1, 1]} : vector<8x15x10xf32> to vector<8x10x10xf32>
    %29 = arith.addf %27, %28 : vector<8x10x10xf32>
    %30 = vector.extract_strided_slice %20 {offsets = [0, 6, 0], sizes = [8, 10, 10], strides = [1, 1, 1]} : vector<8x16x10xf32> to vector<8x10x10xf32>
    %31 = arith.addf %29, %30 : vector<8x10x10xf32>
    %32 = arith.mulf %0, %0 : vector<8x16x16xf32>
    %33 = arith.mulf %1, %1 : vector<8x16x16xf32>
    %34 = arith.addf %32, %33 : vector<8x16x16xf32>
    %35 = vector.shape_cast %34 : vector<8x16x16xf32> to vector<128x16xf32>
    %cst_9 = arith.constant dense<0.000000e+00> : vector<128x10xf32>
    %36 = tpu.matmul %35, %2, %cst_9 {dimension_numbers = #tpu.dot_dimension_numbers<[1], [0], [0], [1], [0, 0, 1, 1], [], []>} : vector<128x16xf32>, vector<16x10xf32>, vector<128x10xf32> -> vector<128x10xf32>
    %37 = vector.shape_cast %36 : vector<128x10xf32> to vector<8x16x10xf32>
    %38 = vector.extract_strided_slice %37 {offsets = [0, 0, 0], sizes = [8, 15, 10], strides = [1, 1, 1]} : vector<8x16x10xf32> to vector<8x15x10xf32>
    %39 = vector.extract_strided_slice %37 {offsets = [0, 1, 0], sizes = [8, 15, 10], strides = [1, 1, 1]} : vector<8x16x10xf32> to vector<8x15x10xf32>
    %40 = arith.addf %38, %39 : vector<8x15x10xf32>
    %41 = vector.extract_strided_slice %40 {offsets = [0, 0, 0], sizes = [8, 13, 10], strides = [1, 1, 1]} : vector<8x15x10xf32> to vector<8x13x10xf32>
    %42 = vector.extract_strided_slice %40 {offsets = [0, 2, 0], sizes = [8, 13, 10], strides = [1, 1, 1]} : vector<8x15x10xf32> to vector<8x13x10xf32>
    %43 = arith.addf %41, %42 : vector<8x13x10xf32>
    %44 = vector.extract_strided_slice %43 {offsets = [0, 0, 0], sizes = [8, 10, 10], strides = [1, 1, 1]} : vector<8x13x10xf32> to vector<8x10x10xf32>
    %45 = vector.extract_strided_slice %40 {offsets = [0, 4, 0], sizes = [8, 10, 10], strides = [1, 1, 1]} : vector<8x15x10xf32> to vector<8x10x10xf32>
    %46 = arith.addf %44, %45 : vector<8x10x10xf32>
    %47 = vector.extract_strided_slice %37 {offsets = [0, 6, 0], sizes = [8, 10, 10], strides = [1, 1, 1]} : vector<8x16x10xf32> to vector<8x10x10xf32>
    %48 = arith.addf %46, %47 : vector<8x10x10xf32>
    %49 = arith.mulf %0, %1 : vector<8x16x16xf32>
    %50 = vector.shape_cast %49 : vector<8x16x16xf32> to vector<128x16xf32>
    %cst_10 = arith.constant dense<0.000000e+00> : vector<128x10xf32>
    %51 = tpu.matmul %50, %2, %cst_10 {dimension_numbers = #tpu.dot_dimension_numbers<[1], [0], [0], [1], [0, 0, 1, 1], [], []>} : vector<128x16xf32>, vector<16x10xf32>, vector<128x10xf32> -> vector<128x10xf32>
    %52 = vector.shape_cast %51 : vector<128x10xf32> to vector<8x16x10xf32>
    %53 = vector.extract_strided_slice %52 {offsets = [0, 0, 0], sizes = [8, 15, 10], strides = [1, 1, 1]} : vector<8x16x10xf32> to vector<8x15x10xf32>
    %54 = vector.extract_strided_slice %52 {offsets = [0, 1, 0], sizes = [8, 15, 10], strides = [1, 1, 1]} : vector<8x16x10xf32> to vector<8x15x10xf32>
    %55 = arith.addf %53, %54 : vector<8x15x10xf32>
    %56 = vector.extract_strided_slice %55 {offsets = [0, 0, 0], sizes = [8, 13, 10], strides = [1, 1, 1]} : vector<8x15x10xf32> to vector<8x13x10xf32>
    %57 = vector.extract_strided_slice %55 {offsets = [0, 2, 0], sizes = [8, 13, 10], strides = [1, 1, 1]} : vector<8x15x10xf32> to vector<8x13x10xf32>
    %58 = arith.addf %56, %57 : vector<8x13x10xf32>
    %59 = vector.extract_strided_slice %58 {offsets = [0, 0, 0], sizes = [8, 10, 10], strides = [1, 1, 1]} : vector<8x13x10xf32> to vector<8x10x10xf32>
    %60 = vector.extract_strided_slice %55 {offsets = [0, 4, 0], sizes = [8, 10, 10], strides = [1, 1, 1]} : vector<8x15x10xf32> to vector<8x10x10xf32>
    %61 = arith.addf %59, %60 : vector<8x10x10xf32>
    %62 = vector.extract_strided_slice %52 {offsets = [0, 6, 0], sizes = [8, 10, 10], strides = [1, 1, 1]} : vector<8x16x10xf32> to vector<8x10x10xf32>
    %63 = arith.addf %61, %62 : vector<8x10x10xf32>
    %64 = arith.mulf %17, %31 : vector<8x10x10xf32>
    %65 = arith.mulf %17, %17 : vector<8x10x10xf32>
    %66 = arith.mulf %31, %31 : vector<8x10x10xf32>
    %67 = arith.addf %65, %66 : vector<8x10x10xf32>
    %cst_11 = arith.constant 2.000000e+00 : f32
    %68 = vector.broadcast %cst_11 : f32 to vector<8x10x10xf32>
    %69 = arith.mulf %68, %64 : vector<8x10x10xf32>
    %cst_12 = arith.constant 9.99999974E-5 : f32
    %70 = vector.broadcast %cst_12 : f32 to vector<8x10x10xf32>
    %71 = arith.addf %69, %70 : vector<8x10x10xf32>
    %cst_13 = arith.constant 9.99999974E-5 : f32
    %72 = vector.broadcast %cst_13 : f32 to vector<8x10x10xf32>
    %73 = arith.addf %67, %72 : vector<8x10x10xf32>
    %74 = arith.subf %63, %64 : vector<8x10x10xf32>
    %cst_14 = arith.constant 2.04166675 : f32
    %75 = vector.broadcast %cst_14 : f32 to vector<8x10x10xf32>
    %76 = arith.mulf %75, %74 : vector<8x10x10xf32>
    %cst_15 = arith.constant 8.99999984E-4 : f32
    %77 = vector.broadcast %cst_15 : f32 to vector<8x10x10xf32>
    %78 = arith.addf %76, %77 : vector<8x10x10xf32>
    %79 = arith.subf %48, %67 : vector<8x10x10xf32>
    %cst_16 = arith.constant 1.02083337 : f32
    %80 = vector.broadcast %cst_16 : f32 to vector<8x10x10xf32>
    %81 = arith.mulf %80, %79 : vector<8x10x10xf32>
    %cst_17 = arith.constant 8.99999984E-4 : f32
    %82 = vector.broadcast %cst_17 : f32 to vector<8x10x10xf32>
    %83 = arith.addf %81, %82 : vector<8x10x10xf32>
    %84 = arith.mulf %71, %78 : vector<8x10x10xf32>
    %85 = arith.mulf %73, %83 : vector<8x10x10xf32>
    %86 = tpu.reciprocal %85 {approx = true} : vector<8x10x10xf32> -> vector<8x10x10xf32>
    %87 = arith.mulf %85, %86 : vector<8x10x10xf32>
    %cst_18 = arith.constant 2.000000e+00 : f32
    %88 = vector.broadcast %cst_18 : f32 to vector<8x10x10xf32>
    %89 = arith.subf %88, %87 : vector<8x10x10xf32>
    %90 = arith.mulf %86, %89 : vector<8x10x10xf32>
    %91 = arith.mulf %84, %90 : vector<8x10x10xf32>
    %cst_19 = arith.constant dense<0.000000e+00> : vector<8x10xf32>
    %92 = vector.multi_reduction <add>, %91, %cst_19 [2] : vector<8x10x10xf32> to vector<8x10xf32>
    %cst_20 = arith.constant dense<0.000000e+00> : vector<8xf32>
    %93 = vector.multi_reduction <add>, %92, %cst_20 [1] : vector<8x10xf32> to vector<8xf32>
    %94 = vector.shape_cast %93 : vector<8xf32> to vector<8x1xf32>
    %95 = arith.addf %3, %94 : vector<8x1xf32>
    %cst_21 = arith.constant 0.00999999977 : f32
    %96 = vector.broadcast %cst_21 : f32 to vector<8x1xf32>
    %97 = arith.mulf %95, %96 : vector<8x1xf32>
    %c0_22 = arith.constant 0 : index
    %c0_23 = arith.constant 0 : index
    %98 = vector.load %arg4[%c0_22, %c0_23] : memref<8x1xf32, #tpu.memory_space<vmem>>, vector<8x1xf32>
    tpu.vector_store %arg4[%c0_22, %c0_23], %97 {strides = array<i32>} : memref<8x1xf32, #tpu.memory_space<vmem>>, vector<8x1xf32>,
    return
  }
  func.func @transform_0(%arg0: i32) -> (i32, i32) {
    %c0_i32 = arith.constant 0 : i32
    %c0_i32_0 = arith.constant 0 : i32
    %c0_i32_1 = arith.constant 0 : i32
    return %c0_i32, %c0_i32_0 : i32, i32
  }
  func.func @transform_1(%arg0: i32) -> (i32, i32, i32) {
    %c0_i32 = arith.constant 0 : i32
    %c0_i32_0 = arith.constant 0 : i32
    %c0_i32_1 = arith.constant 0 : i32
    return %arg0, %c0_i32, %c0_i32_0 : i32, i32, i32
  }
  func.func @transform_2(%arg0: i32) -> (i32, i32, i32) {
    %c0_i32 = arith.constant 0 : i32
    %c0_i32_0 = arith.constant 0 : i32
    %c0_i32_1 = arith.constant 0 : i32
    return %arg0, %c0_i32, %c0_i32_0 : i32, i32, i32
  }
  func.func @transform_3(%arg0: i32) -> (i32, i32) {
    %c0_i32 = arith.constant 0 : i32
    %c0_i32_0 = arith.constant 0 : i32
    return %arg0, %c0_i32 : i32, i32
  }
}

</mosaic_0001>

<bundles_post_ra>
// kernel: tpu_custom_call.1
= control target key start
LH: loop header
LB: loop body
LE: loop exit
PB: predicated region body
PF: predicated region fallthrough
CT: control target
= control target key end

     0   :  { %8 = vsyncpa [#allocation3], 0  ;;  %s4169_s0 = inlined_call_operand.hbm [shape: f32[16,10], index: 0, kind: input, shape index: {}]   ;;  %s4170_s1 = inlined_call_operand.hbm [shape: f32[8,16,16], index: 1, kind: input, shape index: {}]   ;;  %s4171_s2 = inlined_call_operand.hbm [shape: f32[8,16,16], index: 2, kind: input, shape index: {}]   ;;  %s4172_s3 = inlined_call_operand.vmem [shape: f32[8,1], index: 3, kind: output, shape index: {}]  }
   0x1   :  { %9 = vsyncpa [#allocation5], 0  ;;  %s2793_s12 = smov [#allocation4]   ;;  %s2794_s14 = smov [#allocation2]  }
   0x2   :  { %s27_s13 = sshll.u32 %s2793_s12, 4  ;;  %s15_s15 = sshll.u32 %s2794_s14, 4  ;;  %s28_s13 = int_to_ptr.vmem [resolvable:$true] %s27_s13  ;;  %s16_s15 = int_to_ptr.vmem [resolvable:$true] %s15_s15 }
   0x3   :  { %s2737_s16 = scalar_lea.vmem %s28_s13, 2048  ;;  %p2742_p1 = scmp.lt.s32.totalorder %s28_s13, %s28_s13 }
   0x4   :  { %p2738_p0 = scmp.ne.s32.totalorder %s28_s13, %s2737_s16  ;;  %p2743_p2 = scmp.lt.s32.totalorder %s2737_s16, %s2737_s16 }
   0x6   :  { %p2744_p3 = por %p2743_p2, %p2742_p1 }
   0x8   :  { %p2745_p4 = pnand %p2744_p3, %p2738_p0 }
   0xa   :  { %2748 = shalt.err (!%p2745_p4)
}
   0xb   :  { %s2795_s17 = smov 128   ;;  %s2796_s18 = smov 8  }
   0xc   :  { %33 = dma.hbm_to_vmem [thread:$0]  %s4170_s1, 2048, %s28_s13, [#allocation5], %s2795_s17, %s2795_s17, %s2796_s18  }
   0xd   :  { %s2757_s21 = scalar_lea.vmem %s16_s15, 256  ;;  %p2762_p6 = scmp.lt.s32.totalorder %s16_s15, %s16_s15 }
   0xe   :  { %p2758_p5 = scmp.ne.s32.totalorder %s16_s15, %s2757_s21  ;;  %p2763_p7 = scmp.lt.s32.totalorder %s2757_s21, %s2757_s21 }
  0x10   :  { %p2764_p8 = por %p2763_p7, %p2762_p6 }
  0x12   :  { %p2765_p9 = pnand %p2764_p8, %p2758_p5 }
  0x14   :  { %2768 = shalt.err (!%p2765_p9)
}
  0x15   :  { %21 = dma.hbm_to_vmem [thread:$0]  %s4169_s0, 256, %s16_s15, [#allocation3], %s2795_s17, %s2795_s17, %s2796_s18  }
  0x16   :  { %s2797_s24 = smov [#allocation6]  }
  0x17   :  { %s39_s25 = sshll.u32 %s2797_s24, 4  ;;  %s40_s25 = int_to_ptr.vmem [resolvable:$true] %s39_s25 }
  0x18   :  { %s2777_s26 = scalar_lea.vmem %s40_s25, 2048  ;;  %p2782_p11 = scmp.lt.s32.totalorder %s40_s25, %s40_s25 }
  0x19   :  { %p2778_p10 = scmp.ne.s32.totalorder %s40_s25, %s2777_s26  ;;  %p2783_p12 = scmp.lt.s32.totalorder %s2777_s26, %s2777_s26 }
  0x1b   :  { %p2784_p13 = por %p2783_p12, %p2782_p11 }
  0x1d   :  { %p2785_p0 = pnand %p2784_p13, %p2778_p10 }
  0x1f   :  { %2788 = shalt.err (!%p2785_p0)
}
  0x20   :  { %45 = dma.hbm_to_vmem [thread:$0]  %s4171_s2, 2048, %s40_s25, [#allocation5], %s2795_s17, %s2795_s17, %s2796_s18  }
  0x21   :  { %2789 = dma.done.wait [#allocation3], 256  }
  0x22   :  { %2790 = vsyncadd [#allocation3], 4294967040 }
  0x23   :  { %2791 = dma.done.wait [#allocation5], 4096  }
  0x24   :  { %2792 = vsyncadd [#allocation5], 4294963200  ;;  %v88_v0 = vld [vmem:[#allocation2 + $0x8] sm:$0xff]  ;;  %v87_v1 = vld [vmem:[#allocation2] sm:$0xff]  ;;  %vm89_vm0 = vcmask 130048   ;;  %vm299_vm1 = vcmask 1046528  }
  0x25   :  { %2580 = vmatprep.subr.mxu0 %v88_v0  ;;  %2608 = vmatprep.subr.mxu1 %v88_v0  ;;  %v2827_v2 = vld [vmem:[#allocation4] sm:$0xff]  ;;  %v2831_v4 = vld [vmem:[#allocation4 + $0x8] sm:$0xff]  ;;  %v2837_v6 = vld [vmem:[#allocation4 + $0x10] sm:$0xff]  ;;  %vm372_vm2 = vcmask 1045504   ;;  %vm486_vm3 = vcmask 1041408   ;;  %vm429_vm4 = vcmask 1043456  }
  0x26   :  { %2581 = vmatpush3.msra.mxu0 %v88_v0  ;;  %2609 = vmatpush3.msra.mxu1 %v88_v0  ;;  %v2829_v3 = vld [vmem:[#allocation6] sm:$0xff]  ;;  %v2833_v5 = vld [vmem:[#allocation6 + $0x8] sm:$0xff]  ;;  %v2841_v7 = vld [vmem:[#allocation6 + $0x10] sm:$0xff]  ;;  %v992_v28 = vmul.f32 %v2827_v2, %v2827_v2  ;;  %v993_v35 = vmul.f32 %v2831_v4, %v2831_v4  ;;  %v994_v38 = vmul.f32 %v2837_v6, %v2837_v6  ;;  %vm2278_vm5 = vcmask 74752  }
  0x27   :  { %2582 = vmatprep.subr.mxu0 %v87_v1  ;;  %2610 = vmatprep.subr.mxu1 %v87_v1  ;;  %v2849_v8 = vld [vmem:[#allocation4 + $0x18] sm:$0xff]  ;;  %v2855_v10 = vld [vmem:[#allocation4 + $0x20] sm:$0xff]  ;;  %v2867_v12 = vld [vmem:[#allocation4 + $0x28] sm:$0xff]  ;;  %v1008_v29 = vmul.f32 %v2829_v3, %v2829_v3  ;;  %v1489_v34 = vmul.f32 %v2829_v3, %v2827_v2  ;;  %v1009_v36 = vmul.f32 %v2833_v5, %v2833_v5  ;;  %vm2274_vm6 = vcmask 80896  }
  0x28   :  { %2583 = vmatpush3.msra.mxu0 %v87_v1  ;;  %2584 = vmatprep.mubr.msk.f32.mxu0 %vm89_vm0, %v2827_v2  ;;  %v2851_v9 = vld [vmem:[#allocation6 + $0x18] sm:$0xff]  ;;  %v2857_v11 = vld [vmem:[#allocation6 + $0x20] sm:$0xff]  ;;  %v2869_v13 = vld [vmem:[#allocation6 + $0x28] sm:$0xff]  ;;  %v1010_v39 = vmul.f32 %v2841_v7, %v2841_v7  ;;  %v1490_v42 = vmul.f32 %v2833_v5, %v2831_v4  ;;  %v1491_v43 = vmul.f32 %v2841_v7, %v2837_v6  ;;  %vm2351_vm7 = vcmask 130112  }
  0x29   :  { %2611 = vmatpush3.msra.mxu1 %v87_v1  ;;  %2612 = vmatprep.mubr.msk.f32.mxu1 %vm89_vm0, %v2829_v3  ;;  %v2871_v14 = vld [vmem:[#allocation4 + $0x30] sm:$0xff]  ;;  %v2883_v16 = vld [vmem:[#allocation4 + $0x38] sm:$0xff]  ;;  %v2887_v18 = vld [vmem:[#allocation4 + $0x40] sm:$0xff]  ;;  %v1024_v37 = vadd.f32 %v1008_v29, %v992_v28  ;;  %v1025_v44 = vadd.f32 %v1009_v36, %v993_v35  ;;  %v995_v45 = vmul.f32 %v2849_v8, %v2849_v8  ;;  %vm2416_vm8 = vcmask 1041409  }
  0x2a   :  { %2585 = vmatmul.mubr.msk.f32.vlgmr.msra.gmra.mxu0 %vm89_vm0, %v2831_v4  ;;  %2613 = vmatmul.mubr.msk.f32.vlgmr.msra.gmra.mxu1 %vm89_vm0, %v2833_v5  ;;  %v2873_v15 = vld [vmem:[#allocation6 + $0x30] sm:$0xff]  ;;  %v2885_v17 = vld [vmem:[#allocation6 + $0x38] sm:$0xff]  ;;  %v2889_v19 = vld [vmem:[#allocation6 + $0x40] sm:$0xff]  ;;  %v1011_v46 = vmul.f32 %v2851_v9, %v2851_v9  ;;  %v996_v47 = vmul.f32 %v2855_v10, %v2855_v10  ;;  %v1012_v48 = vmul.f32 %v2857_v11, %v2857_v11  ;;  %vm2418_vm9 = vcmask 1042434  }
  0x2b   :  { %2636 = vmatprep.subr.mxu0 %v88_v0  ;;  %2587 = vmatprep.mubr.msk.f32.mxu0 %vm89_vm0, %v2837_v6  ;;  %v2899_v20 = vld [vmem:[#allocation4 + $0x48] sm:$0xff]  ;;  %v2903_v22 = vld [vmem:[#allocation4 + $0x50] sm:$0xff]  ;;  %v2915_v24 = vld [vmem:[#allocation4 + $0x58] sm:$0xff]  ;;  %v1026_v49 = vadd.f32 %v1010_v39, %v994_v38  ;;  %v1492_v50 = vmul.f32 %v2851_v9, %v2849_v8  ;;  %v1493_v51 = vmul.f32 %v2857_v11, %v2855_v10  ;;  %vm2420_vm10 = vcmask 1043459  }
  0x2c   :  { %2637 = vmatpush3.msra.mxu0 %v88_v0  ;;  %2615 = vmatprep.mubr.msk.f32.mxu1 %vm89_vm0, %v2841_v7  ;;  %v2901_v21 = vld [vmem:[#allocation6 + $0x48] sm:$0xff]  ;;  %v2905_v23 = vld [vmem:[#allocation6 + $0x50] sm:$0xff]  ;;  %v2917_v25 = vld [vmem:[#allocation6 + $0x58] sm:$0xff]  ;;  %v997_v52 = vmul.f32 %v2867_v12, %v2867_v12  ;;  %v1013_v53 = vmul.f32 %v2869_v13, %v2869_v13  ;;  %v1027_v54 = vadd.f32 %v1011_v46, %v995_v45  ;;  %vm2422_vm11 = vcmask 1044484  }
  0x2d   :  { %2638 = vmatprep.subr.mxu0 %v87_v1  ;;  %2664 = vmatprep.subr.mxu1 %v88_v0  ;;  %v2919_v26 = vld [vmem:[#allocation4 + $0x60] sm:$0xff]  ;;  %v2935_v30 = vld [vmem:[#allocation4 + $0x68] sm:$0xff]  ;;  %v2939_v32 = vld [vmem:[#allocation4 + $0x70] sm:$0xff]  ;;  %v998_v55 = vmul.f32 %v2871_v14, %v2871_v14  ;;  %v1014_v56 = vmul.f32 %v2873_v15, %v2873_v15  ;;  %v1028_v57 = vadd.f32 %v1012_v48, %v996_v47  ;;  %vm2424_vm12 = vcmask 1045509  }
  0x2e   :  { %2588 = vmatmul.mubr.msk.f32.gmra.mxu0 %vm89_vm0, %v2849_v8  ;;  %2616 = vmatmul.mubr.msk.f32.gmra.mxu1 %vm89_vm0, %v2851_v9  ;;  %v2921_v27 = vld [vmem:[#allocation6 + $0x60] sm:$0xff]  ;;  %v2937_v31 = vld [vmem:[#allocation6 + $0x68] sm:$0xff]  ;;  %v2941_v33 = vld [vmem:[#allocation6 + $0x70] sm:$0xff]  ;;  %v1494_v58 = vmul.f32 %v2869_v13, %v2867_v12  ;;  %v1495_v59 = vmul.f32 %v2873_v15, %v2871_v14  ;;  %v999_v60 = vmul.f32 %v2883_v16, %v2883_v16  ;;  %vm2426_vm13 = vcmask 1046534  }
  0x2f   :  { %2590 = vmatprep.mubr.msk.f32.mxu0 %vm89_vm0, %v2855_v10  ;;  %2618 = vmatprep.mubr.msk.f32.mxu1 %vm89_vm0, %v2857_v11  ;;  %v2961_v40 = vld [vmem:[#allocation4 + $0x78] sm:$0xff]  ;;  %v1015_v61 = vmul.f32 %v2885_v17, %v2885_v17  ;;  %v1029_v62 = vadd.f32 %v1013_v53, %v997_v52  ;;  %v1000_v63 = vmul.f32 %v2887_v18, %v2887_v18  ;;  %vm2428_vm14 = vcmask 1047559  }
  0x30   :  { %2639 = vmatpush3.msra.mxu0 %v87_v1  ;;  %2665 = vmatpush3.msra.mxu1 %v88_v0  ;;  %v2963_v41 = vld [vmem:[#allocation6 + $0x78] sm:$0xff]  ;;  %v1016_v0 = vmul.f32 %v2889_v19, %v2889_v19  ;;  %v1496_v2 = vmul.f32 %v2885_v17, %v2883_v16  ;;  %v1497_v3 = vmul.f32 %v2889_v19, %v2887_v18  ;;  %vm2436_vm15 = vcmask 7168  }
  0x31   :  { %2666 = vmatprep.subr.mxu1 %v87_v1  ;;  %v1001_v4 = vmul.f32 %v2899_v20, %v2899_v20  ;;  %v1017_v5 = vmul.f32 %v2901_v21, %v2901_v21  ;;  %v1031_v6 = vadd.f32 %v1015_v61, %v999_v60  ;;  %v1002_v7 = vmul.f32 %v2903_v22, %v2903_v22 }
  0x32   :  { %2591 = vmatmul.mubr.msk.f32.gmra.mxu0 %vm89_vm0, %v2867_v12  ;;  %2619 = vmatmul.mubr.msk.f32.gmra.mxu1 %vm89_vm0, %v2869_v13  ;;  %v1018_v8 = vmul.f32 %v2905_v23, %v2905_v23  ;;  %v1032_v9 = vadd.f32 %v1016_v0, %v1000_v63  ;;  %v1498_v10 = vmul.f32 %v2901_v21, %v2899_v20 }
  0x33   :  { %2593 = vmatprep.mubr.msk.f32.mxu0 %vm89_vm0, %v2871_v14  ;;  %2621 = vmatprep.mubr.msk.f32.mxu1 %vm89_vm0, %v2873_v15  ;;  %v1499_v11 = vmul.f32 %v2905_v23, %v2903_v22  ;;  %v1003_v12 = vmul.f32 %v2915_v24, %v2915_v24  ;;  %v1019_v13 = vmul.f32 %v2917_v25, %v2917_v25 }
  0x34   :  { %2667 = vmatpush3.msra.mxu1 %v87_v1  ;;  %v1030_v1 = vadd.f32 %v1014_v56, %v998_v55  ;;  %v1033_v14 = vadd.f32 %v1017_v5, %v1001_v4  ;;  %v1004_v15 = vmul.f32 %v2919_v26, %v2919_v26  ;;  %v1023_v28 = vmul.f32 %v2963_v41, %v2963_v41 }
  0x36   :  { %2594 = vmatmul.mubr.msk.f32.gmra.mxu0 %vm89_vm0, %v2883_v16  ;;  %2622 = vmatmul.mubr.msk.f32.gmra.mxu1 %vm89_vm0, %v2885_v17  ;;  %v1020_v16 = vmul.f32 %v2921_v27, %v2921_v27  ;;  %v1034_v17 = vadd.f32 %v1018_v8, %v1002_v7 }
  0x37   :  { %2596 = vmatprep.mubr.msk.f32.mxu0 %vm89_vm0, %v2887_v18  ;;  %2624 = vmatprep.mubr.msk.f32.mxu1 %vm89_vm0, %v2889_v19  ;;  %v1500_v18 = vmul.f32 %v2917_v25, %v2915_v24  ;;  %v1501_v19 = vmul.f32 %v2921_v27, %v2919_v26 }
  0x3a   :  { %2597 = vmatmul.mubr.msk.f32.gmra.mxu0 %vm89_vm0, %v2899_v20  ;;  %2625 = vmatmul.mubr.msk.f32.gmra.mxu1 %vm89_vm0, %v2901_v21  ;;  %v1005_v20 = vmul.f32 %v2935_v30, %v2935_v30  ;;  %v1021_v21 = vmul.f32 %v2937_v31, %v2937_v31 }
  0x3b   :  { %2599 = vmatprep.mubr.msk.f32.mxu0 %vm89_vm0, %v2903_v22  ;;  %2627 = vmatprep.mubr.msk.f32.mxu1 %vm89_vm0, %v2905_v23  ;;  %v1035_v22 = vadd.f32 %v1019_v13, %v1003_v12  ;;  %v1006_v23 = vmul.f32 %v2939_v32, %v2939_v32 }
  0x3c   :  { %v1037_v29 = vadd.f32 %v1021_v21, %v1005_v20 }
  0x3e   :  { %2600 = vmatmul.mubr.msk.f32.gmra.mxu0 %vm89_vm0, %v2915_v24  ;;  %2628 = vmatmul.mubr.msk.f32.gmra.mxu1 %vm89_vm0, %v2917_v25  ;;  %v1022_v24 = vmul.f32 %v2941_v33, %v2941_v33  ;;  %v1036_v25 = vadd.f32 %v1020_v16, %v1004_v15 }
  0x3f   :  { %2602 = vmatprep.mubr.msk.f32.mxu0 %vm89_vm0, %v2919_v26  ;;  %2630 = vmatprep.mubr.msk.f32.mxu1 %vm89_vm0, %v2921_v27  ;;  %v1502_v26 = vmul.f32 %v2937_v31, %v2935_v30  ;;  %v1007_v27 = vmul.f32 %v2961_v40, %v2961_v40 }
  0x40   :  { %v1038_v35 = vadd.f32 %v1022_v24, %v1006_v23 }
  0x42   :  { %2603 = vmatmul.mubr.msk.f32.gmra.mxu0 %vm89_vm0, %v2935_v30  ;;  %2631 = vmatmul.mubr.msk.f32.gmra.mxu1 %vm89_vm0, %v2937_v31  ;;  %v1504_v30 = vmul.f32 %v2963_v41, %v2961_v40  ;;  %v1039_v31 = vadd.f32 %v1023_v28, %v1007_v27 }
  0x43   :  { %2605 = vmatprep.mubr.msk.f32.mxu0 %vm89_vm0, %v2939_v32  ;;  %2633 = vmatprep.mubr.msk.f32.mxu1 %vm89_vm0, %v2941_v33 }
  0x46   :  { %2606 = vmatmul.mubr.msk.f32.gmra.mxu0 %vm89_vm0, %v2961_v40  ;;  %2634 = vmatmul.mubr.msk.f32.gmra.mxu1 %vm89_vm0, %v2963_v41 }
  0x47   :  { %2640 = vmatprep.mubr.msk.f32.mxu0 %vm89_vm0, %v1024_v37  ;;  %2668 = vmatprep.mubr.msk.f32.mxu1 %vm89_vm0, %v1489_v34  ;;  %v1503_v34 = vmul.f32 %v2941_v33, %v2939_v32 }
  0x4a   :  { %2641 = vmatmul.mubr.msk.f32.vlgmr.msra.gmra.mxu0 %vm89_vm0, %v1025_v44  ;;  %2669 = vmatmul.mubr.msk.f32.vlgmr.msra.gmra.mxu1 %vm89_vm0, %v1490_v42 }
  0x4b   :  { %2643 = vmatprep.mubr.msk.f32.mxu0 %vm89_vm0, %v1026_v49  ;;  %2671 = vmatprep.mubr.msk.f32.mxu1 %vm89_vm0, %v1491_v43 }
  0x4e   :  { %2644 = vmatmul.mubr.msk.f32.gmra.mxu0 %vm89_vm0, %v1027_v54  ;;  %2672 = vmatmul.mubr.msk.f32.gmra.mxu1 %vm89_vm0, %v1492_v50 }
  0x4f   :  { %2646 = vmatprep.mubr.msk.f32.mxu0 %vm89_vm0, %v1028_v57  ;;  %2674 = vmatprep.mubr.msk.f32.mxu1 %vm89_vm0, %v1493_v51 }
  0x52   :  { %2647 = vmatmul.mubr.msk.f32.gmra.mxu0 %vm89_vm0, %v1029_v62  ;;  %2675 = vmatmul.mubr.msk.f32.gmra.mxu1 %vm89_vm0, %v1494_v58 }
  0x53   :  { %2649 = vmatprep.mubr.msk.f32.mxu0 %vm89_vm0, %v1030_v1  ;;  %2677 = vmatprep.mubr.msk.f32.mxu1 %vm89_vm0, %v1495_v59 }
  0x56   :  { %2650 = vmatmul.mubr.msk.f32.gmra.mxu0 %vm89_vm0, %v1031_v6  ;;  %2678 = vmatmul.mubr.msk.f32.gmra.mxu1 %vm89_vm0, %v1496_v2 }
  0x57   :  { %2652 = vmatprep.mubr.msk.f32.mxu0 %vm89_vm0, %v1032_v9  ;;  %2680 = vmatprep.mubr.msk.f32.mxu1 %vm89_vm0, %v1497_v3 }
  0x5a   :  { %2653 = vmatmul.mubr.msk.f32.gmra.mxu0 %vm89_vm0, %v1033_v14  ;;  %2681 = vmatmul.mubr.msk.f32.gmra.mxu1 %vm89_vm0, %v1498_v10 }
  0x5b   :  { %2655 = vmatprep.mubr.msk.f32.mxu0 %vm89_vm0, %v1034_v17  ;;  %2683 = vmatprep.mubr.msk.f32.mxu1 %vm89_vm0, %v1499_v11 }
  0x5e   :  { %2656 = vmatmul.mubr.msk.f32.gmra.mxu0 %vm89_vm0, %v1035_v22  ;;  %2684 = vmatmul.mubr.msk.f32.gmra.mxu1 %vm89_vm0, %v1500_v18 }
  0x5f   :  { %2658 = vmatprep.mubr.msk.f32.mxu0 %vm89_vm0, %v1036_v25  ;;  %2686 = vmatprep.mubr.msk.f32.mxu1 %vm89_vm0, %v1501_v19 }
  0x62   :  { %2659 = vmatmul.mubr.msk.f32.gmra.mxu0 %vm89_vm0, %v1037_v29  ;;  %2687 = vmatmul.mubr.msk.f32.gmra.mxu1 %vm89_vm0, %v1502_v26 }
  0x63   :  { %2661 = vmatprep.mubr.msk.f32.mxu0 %vm89_vm0, %v1038_v35  ;;  %2689 = vmatprep.mubr.msk.f32.mxu1 %vm89_vm0, %v1503_v34 }
  0x66   :  { %2662 = vmatmul.mubr.msk.f32.gmra.mxu0 %vm89_vm0, %v1039_v31  ;;  %2690 = vmatmul.mubr.msk.f32.gmra.mxu1 %vm89_vm0, %v1504_v30 }
  0xea   :  { %v2586_v32 = vpop.f32.mrf.mxu0  ;;  %v2614_v33 = vpop.f32.mrf.mxu1 }
  0xeb   :  { %v301_v36 = vrot.slane %v2586_v32, 1  ;;  %v753_v37 = vrot.slane %v2614_v33, 1  ;;  %v488_v10 = vrot.slane %v2586_v32, 6  ;;  %v937_v12 = vrot.slane %v2614_v33, 6 }
  0xec   :  { %v204_v38 = vpop.f32.mrf.mxu0  ;;  %v657_v39 = vpop.f32.mrf.mxu1 }
  0xed   :  { %v300_v40 = vrot.slane %v204_v38, 1  ;;  %v752_v41 = vrot.slane %v657_v39, 1  ;;  %v341_v42 = vadd.f32 %v2586_v32, %v301_v36  ;;  %v793_v43 = vadd.f32 %v2614_v33, %v753_v37 }
  0xee   :  { %v3085_v48 = vpop.f32.mrf.mxu0  ;;  %v3087_v50 = vpop.f32.mrf.mxu1  ;;  %v487_v61 = vrot.slane %v204_v38, 6  ;;  %v936_v7 = vrot.slane %v657_v39, 6 }
  0xef   :  { %v302_v44 = vsel %vm299_vm1, %v300_v40, %v301_v36  ;;  %v754_v45 = vsel %vm299_vm1, %v752_v41, %v753_v37  ;;  %v374_v49 = vrot.slane %v341_v42, 2  ;;  %v825_v51 = vrot.slane %v793_v43, 2 }
  0xf0   :  { %v340_v46 = vadd.f32 %v302_v44, %v204_v38  ;;  %v792_v47 = vadd.f32 %v754_v45, %v657_v39  ;;  %v304_v52 = vrot.slane %v3085_v48, 1  ;;  %v756_v55 = vrot.slane %v3087_v50, 1  ;;  %v3091_v56 = vpop.f32.mrf.mxu0  ;;  %v3093_v58 = vpop.f32.mrf.mxu1 }
  0xf1   :  { %v414_v57 = vadd.f32 %v374_v49, %v341_v42  ;;  %v865_v59 = vadd.f32 %v825_v51, %v793_v43  ;;  %v881_v60 = vrot.slane %v793_v43, 4  ;;  %v431_v62 = vrot.slane %v341_v42, 4 }
  0xf2   :  { %v373_v53 = vrot.slane %v340_v46, 2  ;;  %v824_v54 = vrot.slane %v792_v47, 2  ;;  %v880_v63 = vrot.slane %v792_v47, 4  ;;  %v3096_v0 = vadd.f32 %v3085_v48, %v304_v52  ;;  %v3106_v9 = vpop.f32.mrf.mxu0  ;;  %v3110_v18 = vpop.f32.mrf.mxu1 }
  0xf3   :  { %v303_v1 = vrot.slane %v3091_v56, 1  ;;  %v3102_v4 = vadd.f32 %v3087_v50, %v756_v55  ;;  %v755_v5 = vrot.slane %v3093_v58, 1  ;;  %v471_v6 = vadd.f32 %v431_v62, %v414_v57 }
  0xf4   :  { %v375_v2 = vsel %vm372_vm2, %v373_v53, %v374_v49  ;;  %v826_v3 = vsel %vm372_vm2, %v824_v54, %v825_v51  ;;  %v921_v11 = vadd.f32 %v881_v60, %v865_v59  ;;  %v430_v13 = vrot.slane %v340_v46, 4  ;;  %v3119_v27 = vpop.f32.mrf.mxu0  ;;  %v3136_v44 = vpop.f32.mrf.mxu1 }
  0xf5   :  { %v305_v8 = vsel %vm299_vm1, %v303_v1, %v304_v52  ;;  %v413_v14 = vadd.f32 %v375_v2, %v340_v46  ;;  %v864_v15 = vadd.f32 %v826_v3, %v792_v47  ;;  %v377_v16 = vrot.slane %v3096_v0, 2 }
  0xf6   :  { %v757_v17 = vsel %vm299_vm1, %v755_v5, %v756_v55  ;;  %v489_v19 = vsel %vm486_vm3, %v487_v61, %v488_v10  ;;  %v882_v20 = vsel %vm429_vm4, %v880_v63, %v881_v60  ;;  %v828_v21 = vrot.slane %v3102_v4, 2  ;;  %v3163_v2 = vpop.f32.mrf.mxu1 }
  0xf7   :  { %v342_v22 = vadd.f32 %v305_v8, %v3091_v56  ;;  %v528_v23 = vadd.f32 %v488_v10, %v471_v6  ;;  %v938_v24 = vsel %vm486_vm3, %v936_v7, %v937_v12  ;;  %v491_v25 = vrot.slane %v3085_v48, 6 }
  0xf8   :  { %v307_v26 = vrot.slane %v3106_v9, 1  ;;  %v977_v28 = vadd.f32 %v937_v12, %v921_v11  ;;  %v432_v29 = vsel %vm429_vm4, %v430_v13, %v431_v62  ;;  %v794_v34 = vadd.f32 %v757_v17, %v3093_v58  ;;  %v3158_v62 = vpop.f32.mrf.mxu0 }
  0xf9   :  { %v759_v35 = vrot.slane %v3110_v18, 1  ;;  %v470_v30 = vadd.f32 %v432_v29, %v413_v14  ;;  %v920_v31 = vadd.f32 %v882_v20, %v864_v15  ;;  %v416_v32 = vadd.f32 %v377_v16, %v3096_v0 }
  0xfa   :  { %v940_v33 = vrot.slane %v3087_v50, 6  ;;  %v867_v36 = vadd.f32 %v828_v21, %v3102_v4  ;;  %v884_v37 = vrot.slane %v3102_v4, 4  ;;  %v376_v38 = vrot.slane %v342_v22, 2 }
  0xfb   :  { %v306_v39 = vrot.slane %v3119_v27, 1  ;;  %v3129_v40 = vmul.f32 %v528_v23, %v528_v23  ;;  %v434_v41 = vrot.slane %v3096_v0, 4  ;;  %v490_v42 = vrot.slane %v3091_v56, 6 }
  0xfc   :  { %v3134_v43 = vadd.f32 %v3106_v9, %v307_v26  ;;  %v3138_v45 = vmul.f32 %v977_v28, %v528_v23  ;;  %v827_v46 = vrot.slane %v794_v34, 2  ;;  %v3141_v47 = vadd.f32 %v3110_v18, %v759_v35 }
  0xfd   :  { %v308_v48 = vsel %vm299_vm1, %v306_v39, %v307_v26  ;;  %v3144_v49 = vadd.f32 %v489_v19, %v470_v30  ;;  %v3146_v50 = vadd.f32 %v938_v24, %v920_v31  ;;  %v473_v51 = vadd.f32 %v434_v41, %v416_v32 }
  0xfe   :  { %4207 = vst [vmem:[#allocation9_spill] sm:$0xff] %v3138_v45  ;;  %v939_v52 = vrot.slane %v3093_v58, 6  ;;  %v923_v53 = vadd.f32 %v884_v37, %v867_v36  ;;  %v378_v54 = vsel %vm372_vm2, %v376_v38, %v377_v16  ;;  %v3151_v55 = vadd.f32 %v308_v48, %v3119_v27  ;;  %v3179_v16 = vpop.f32.mrf.mxu0 }
  0xff   :  { %4208 = vst [vmem:[#allocation10_spill] sm:$0xff] %v3144_v49  ;;  %4209 = vst [vmem:[#allocation11_spill] sm:$0xff] %v3146_v50  ;;  %v758_v56 = vrot.slane %v3136_v44, 1  ;;  %v3154_v57 = vmul.f32 %v977_v28, %v977_v28  ;;  %v433_v59 = vrot.slane %v342_v22, 4  ;;  %v492_v60 = vsel %vm486_vm3, %v490_v42, %v491_v25 }
 0x100   :  { %v380_v61 = vrot.slane %v3134_v43, 2  ;;  %v829_v63 = vsel %vm372_vm2, %v827_v46, %v828_v21  ;;  %v883_v58 = vrot.slane %v794_v34, 4  ;;  %v831_v0 = vrot.slane %v3141_v47, 2 }
 0x101   :  { %v760_v1 = vsel %vm299_vm1, %v758_v56, %v759_v35  ;;  %v3167_v3 = vmul.f32 %v3144_v49, %v3144_v49  ;;  %v3171_v4 = vmul.f32 %v3146_v50, %v3146_v50  ;;  %v530_v5 = vadd.f32 %v491_v25, %v473_v51  ;;  %v3216_v56 = vpop.f32.mrf.mxu0 }
 0x102   :  { %v415_v6 = vadd.f32 %v378_v54, %v342_v22  ;;  %v979_v7 = vadd.f32 %v940_v33, %v923_v53  ;;  %v941_v8 = vsel %vm486_vm3, %v939_v52, %v940_v33  ;;  %v379_v10 = vrot.slane %v3151_v55, 2  ;;  %v3185_v22 = vpop.f32.mrf.mxu1 }
 0x103   :  { %v796_v11 = vadd.f32 %v760_v1, %v3136_v44  ;;  %v435_v12 = vsel %vm429_vm4, %v433_v59, %v434_v41  ;;  %v866_v13 = vadd.f32 %v829_v63, %v794_v34  ;;  %v418_v14 = vadd.f32 %v380_v61, %v3134_v43 }
 0x104   :  { %v310_v15 = vrot.slane %v3158_v62, 1  ;;  %v885_v17 = vsel %vm429_vm4, %v883_v58, %v884_v37  ;;  %v869_v19 = vadd.f32 %v831_v0, %v3141_v47  ;;  %v887_v20 = vrot.slane %v3141_v47, 4 }
 0x105   :  { %v762_v21 = vrot.slane %v3163_v2, 1  ;;  %v3187_v23 = vmul.f32 %v530_v5, %v530_v5  ;;  %v472_v24 = vadd.f32 %v435_v12, %v415_v6  ;;  %v437_v25 = vrot.slane %v3134_v43, 4 }
 0x106   :  { %v494_v26 = vrot.slane %v3106_v9, 6  ;;  %v3191_v28 = vmul.f32 %v979_v7, %v530_v5  ;;  %v381_v29 = vsel %vm372_vm2, %v379_v10, %v380_v61  ;;  %v830_v34 = vrot.slane %v796_v11, 2  ;;  %v3222_v61 = vpop.f32.mrf.mxu1 }
 0x107   :  { %v309_v35 = vrot.slane %v3179_v16, 1  ;;  %v922_v30 = vadd.f32 %v885_v17, %v866_v13  ;;  %v475_v31 = vadd.f32 %v437_v25, %v418_v14  ;;  %v3196_v32 = vadd.f32 %v3158_v62, %v310_v15  ;;  %v3240_v14 = vpop.f32.mrf.mxu0 }
 0x108   :  { %4210 = vst [vmem:[#allocation12_spill] sm:$0xff] %v3191_v28  ;;  %v761_v33 = vrot.slane %v3185_v22, 1  ;;  %v925_v36 = vadd.f32 %v887_v20, %v869_v19  ;;  %v943_v37 = vrot.slane %v3110_v18, 6  ;;  %v436_v38 = vrot.slane %v3151_v55, 4 }
 0x109   :  { %v3202_v9 = vadd.f32 %v3163_v2, %v762_v21  ;;  %v3204_v39 = vadd.f32 %v492_v60, %v472_v24  ;;  %v417_v41 = vadd.f32 %v381_v29, %v3151_v55  ;;  %v493_v42 = vrot.slane %v3119_v27, 6 }
 0x10a   :  { %v311_v43 = vsel %vm299_vm1, %v309_v35, %v310_v15  ;;  %v832_v46 = vsel %vm372_vm2, %v830_v34, %v831_v0  ;;  %v886_v47 = vrot.slane %v796_v11, 4  ;;  %v942_v48 = vrot.slane %v3136_v44, 6 }
 0x10b   :  { %4211 = vst [vmem:[#allocation13_spill] sm:$0xff] %v3204_v39  ;;  %v346_v18 = vadd.f32 %v311_v43, %v3179_v16  ;;  %v3212_v51 = vadd.f32 %v941_v8, %v922_v30  ;;  %v532_v52 = vadd.f32 %v494_v26, %v475_v31  ;;  %v383_v53 = vrot.slane %v3196_v32, 2 }
 0x10c   :  { %v763_v54 = vsel %vm299_vm1, %v761_v33, %v762_v21  ;;  %v3218_v55 = vmul.f32 %v979_v7, %v979_v7  ;;  %v981_v27 = vadd.f32 %v943_v37, %v925_v36  ;;  %v438_v59 = vsel %vm429_vm4, %v436_v38, %v437_v25 }
 0x10d   :  { %4212 = vst [vmem:[#allocation14_spill] sm:$0xff] %v3212_v51  ;;  %v834_v60 = vrot.slane %v3202_v9, 2  ;;  %v3226_v44 = vmul.f32 %v3204_v39, %v3204_v39  ;;  %v474_v63 = vadd.f32 %v438_v59, %v417_v41  ;;  %v495_v58 = vsel %vm486_vm3, %v493_v42, %v494_v26  ;;  %v3264_v41 = vpop.f32.mrf.mxu0 }
 0x10e   :  { %v868_v0 = vadd.f32 %v832_v46, %v796_v11  ;;  %v888_v1 = vsel %vm429_vm4, %v886_v47, %v887_v20  ;;  %v382_v5 = vrot.slane %v346_v18, 2  ;;  %v798_v6 = vadd.f32 %v763_v54, %v3185_v22  ;;  %v3247_v20 = vpop.f32.mrf.mxu1 }
 0x10f   :  { %v313_v7 = vrot.slane %v3216_v56, 1  ;;  %v3234_v8 = vmul.f32 %v3212_v51, %v3212_v51  ;;  %v3236_v10 = vmul.f32 %v532_v52, %v532_v52  ;;  %v944_v12 = vsel %vm486_vm3, %v942_v48, %v943_v37 }
 0x110   :  { %v420_v13 = vadd.f32 %v383_v53, %v3196_v32  ;;  %v3242_v11 = vmul.f32 %v981_v27, %v532_v52  ;;  %v497_v15 = vrot.slane %v3158_v62, 6  ;;  %v871_v17 = vadd.f32 %v834_v60, %v3202_v9 }
 0x111   :  { %v890_v19 = vrot.slane %v3202_v9, 4  ;;  %v3249_v21 = vmul.f32 %v981_v27, %v981_v27  ;;  %v3251_v24 = vadd.f32 %v495_v58, %v474_v63  ;;  %v924_v25 = vadd.f32 %v888_v1, %v868_v0  ;;  %v3279_v63 = vpop.f32.mrf.mxu1  ;;  %v3284_v1 = vpop.f32.mrf.mxu0 }
 0x112   :  { %4213 = vst [vmem:[#allocation15_spill] sm:$0xff] %v3242_v11  ;;  %v440_v26 = vrot.slane %v3196_v32, 4  ;;  %v384_v29 = vsel %vm372_vm2, %v382_v5, %v383_v53  ;;  %v833_v34 = vrot.slane %v798_v6, 2  ;;  %v3256_v35 = vadd.f32 %v3216_v56, %v313_v7 }
 0x113   :  { %4214 = vst [vmem:[#allocation16_spill] sm:$0xff] %v3251_v24  ;;  %v312_v62 = vrot.slane %v3240_v14, 1  ;;  %v946_v31 = vrot.slane %v3163_v2, 6  ;;  %v496_v33 = vrot.slane %v3179_v16, 6  ;;  %v764_v36 = vrot.slane %v3247_v20, 1 }
 0x114   :  { %v477_v30 = vadd.f32 %v440_v26, %v420_v13  ;;  %v927_v37 = vadd.f32 %v890_v19, %v871_v17  ;;  %v439_v38 = vrot.slane %v346_v18, 4  ;;  %v765_v9 = vrot.slane %v3222_v61, 1 }
 0x115   :  { %v314_v32 = vsel %vm299_vm1, %v312_v62, %v313_v7  ;;  %v3268_v42 = vmul.f32 %v3251_v24, %v3251_v24  ;;  %v3270_v43 = vadd.f32 %v944_v12, %v924_v25  ;;  %v419_v46 = vadd.f32 %v384_v29, %v346_v18 }
 0x116   :  { %v889_v2 = vrot.slane %v798_v6, 4  ;;  %v835_v16 = vsel %vm372_vm2, %v833_v34, %v834_v60  ;;  %v386_v47 = vrot.slane %v3256_v35, 2  ;;  %v348_v48 = vadd.f32 %v314_v32, %v3240_v14 }
 0x117   :  { %4215 = vst [vmem:[#allocation17_spill] sm:$0xff] %v3270_v43  ;;  %v766_v52 = vsel %vm299_vm1, %v764_v36, %v765_v9  ;;  %v534_v53 = vadd.f32 %v497_v15, %v477_v30  ;;  %v498_v54 = vsel %vm486_vm3, %v496_v33, %v497_v15  ;;  %v945_v27 = vrot.slane %v3185_v22, 6 }
 0x118   :  { %v800_v59 = vadd.f32 %v766_v52, %v3247_v20  ;;  %v983_v58 = vadd.f32 %v946_v31, %v927_v37  ;;  %v441_v18 = vsel %vm429_vm4, %v439_v38, %v440_v26  ;;  %v801_v60 = vadd.f32 %v3222_v61, %v765_v9 }
 0x119   :  { %v316_v0 = vrot.slane %v3264_v41, 1  ;;  %v3288_v5 = vmul.f32 %v3270_v43, %v3270_v43  ;;  %v476_v7 = vadd.f32 %v441_v18, %v419_v46  ;;  %v870_v12 = vadd.f32 %v835_v16, %v798_v6  ;;  %v3320_v18 = vpop.f32.mrf.mxu0 }
 0x11a   :  { %v500_v22 = vrot.slane %v3216_v56, 6  ;;  %v891_v13 = vsel %vm429_vm4, %v889_v2, %v890_v19  ;;  %v422_v15 = vadd.f32 %v386_v47, %v3256_v35  ;;  %v385_v17 = vrot.slane %v348_v48, 2  ;;  %v3304_v19 = vpop.f32.mrf.mxu1 }
 0x11b   :  { %v768_v25 = vrot.slane %v3279_v63, 1  ;;  %v3294_v26 = vmul.f32 %v534_v53, %v534_v53  ;;  %v947_v29 = vsel %vm486_vm3, %v945_v27, %v946_v31  ;;  %v836_v34 = vrot.slane %v800_v59, 2 }
 0x11c   :  { %v315_v62 = vrot.slane %v3284_v1, 1  ;;  %v3298_v30 = vmul.f32 %v983_v58, %v534_v53  ;;  %v443_v6 = vrot.slane %v3256_v35, 4  ;;  %v837_v33 = vrot.slane %v801_v60, 2 }
 0x11d   :  { %v3302_v56 = vadd.f32 %v3264_v41, %v316_v0  ;;  %v3306_v36 = vmul.f32 %v983_v58, %v983_v58  ;;  %v3308_v37 = vadd.f32 %v498_v54, %v476_v7  ;;  %v926_v38 = vadd.f32 %v891_v13, %v870_v12 }
 0x11e   :  { %4216 = vst [vmem:[#allocation18_spill] sm:$0xff] %v3298_v30  ;;  %v499_v31 = vrot.slane %v3240_v14, 6  ;;  %v479_v9 = vadd.f32 %v443_v6, %v422_v15  ;;  %v387_v32 = vsel %vm372_vm2, %v385_v17, %v386_v47  ;;  %v948_v46 = vrot.slane %v3247_v20, 6 }
 0x11f   :  { %4217 = vst [vmem:[#allocation19_spill] sm:$0xff] %v3308_v37  ;;  %v3314_v35 = vadd.f32 %v3279_v63, %v768_v25  ;;  %v838_v2 = vsel %vm372_vm2, %v836_v34, %v837_v33  ;;  %v892_v16 = vrot.slane %v800_v59, 4  ;;  %v317_v52 = vsel %vm299_vm1, %v315_v62, %v316_v0  ;;  %v3335_v62 = vpop.f32.mrf.mxu1 }
 0x120   :  { %v767_v53 = vrot.slane %v3304_v19, 1  ;;  %v873_v54 = vadd.f32 %v837_v33, %v801_v60  ;;  %v893_v27 = vrot.slane %v801_v60, 4  ;;  %v442_v58 = vrot.slane %v348_v48, 4 }
 0x121   :  { %v389_v14 = vrot.slane %v3302_v56, 2  ;;  %v3322_v47 = vadd.f32 %v947_v29, %v926_v38  ;;  %v421_v20 = vadd.f32 %v387_v32, %v348_v48  ;;  %v350_v7 = vadd.f32 %v317_v52, %v3284_v1  ;;  %v3340_v38 = vpop.f32.mrf.mxu0 }
 0x122   :  { %v769_v12 = vsel %vm299_vm1, %v767_v53, %v768_v25  ;;  %v949_v13 = vrot.slane %v3222_v61, 6  ;;  %v501_v0 = vsel %vm486_vm3, %v499_v31, %v500_v22  ;;  %v872_v15 = vadd.f32 %v838_v2, %v800_v59 }
 0x123   :  { %4218 = vst [vmem:[#allocation20_spill] sm:$0xff] %v3322_v47  ;;  %v840_v17 = vrot.slane %v3314_v35, 2  ;;  %v3331_v60 = vmul.f32 %v3308_v37, %v3308_v37  ;;  %v536_v34 = vadd.f32 %v500_v22, %v479_v9  ;;  %v894_v29 = vsel %vm429_vm4, %v892_v16, %v893_v27 }
 0x124   :  { %v802_v48 = vadd.f32 %v769_v12, %v3304_v19  ;;  %v929_v33 = vadd.f32 %v893_v27, %v873_v54  ;;  %v444_v25 = vsel %vm429_vm4, %v442_v58, %v443_v6  ;;  %v424_v61 = vadd.f32 %v389_v14, %v3302_v56  ;;  %v3354_v12 = vpop.f32.mrf.mxu1 }
 0x125   :  { %v319_v59 = vrot.slane %v3320_v18, 1  ;;  %v3344_v31 = vmul.f32 %v3322_v47, %v3322_v47  ;;  %v478_v22 = vadd.f32 %v444_v25, %v421_v20  ;;  %v950_v9 = vsel %vm486_vm3, %v948_v46, %v949_v13 }
 0x126   :  { %v388_v32 = vrot.slane %v350_v7, 2  ;;  %v928_v2 = vadd.f32 %v894_v29, %v872_v15  ;;  %v446_v16 = vrot.slane %v3302_v56, 4  ;;  %v875_v52 = vadd.f32 %v840_v17, %v3314_v35 }
 0x127   :  { %v896_v6 = vrot.slane %v3314_v35, 4  ;;  %v3350_v53 = vmul.f32 %v536_v34, %v536_v34  ;;  %v839_v54 = vrot.slane %v802_v48, 2  ;;  %v771_v27 = vrot.slane %v3335_v62, 1 }
 0x128   :  { %v318_v58 = vrot.slane %v3340_v38, 1  ;;  %v985_v20 = vadd.f32 %v949_v13, %v929_v33  ;;  %v481_v25 = vadd.f32 %v446_v16, %v424_v61  ;;  %v503_v46 = vrot.slane %v3264_v41, 6 }
 0x129   :  { %v3358_v15 = vadd.f32 %v3320_v18, %v319_v59  ;;  %v3360_v56 = vadd.f32 %v501_v0, %v478_v22  ;;  %v952_v35 = vrot.slane %v3279_v63, 6  ;;  %v390_v29 = vsel %vm372_vm2, %v388_v32, %v389_v14  ;;  %v3373_v22 = vpop.f32.mrf.mxu0 }
 0x12a   :  { %v502_v47 = vrot.slane %v3284_v1, 6  ;;  %v3365_v37 = vadd.f32 %v950_v9, %v928_v2  ;;  %v931_v30 = vadd.f32 %v896_v6, %v875_v52  ;;  %v320_v43 = vsel %vm299_vm1, %v318_v58, %v319_v59 }
 0x12b   :  { %4219 = vst [vmem:[#allocation21_spill] sm:$0xff] %v3360_v56  ;;  %v770_v13 = vrot.slane %v3354_v12, 1  ;;  %v445_v33 = vrot.slane %v350_v7, 4  ;;  %v841_v41 = vsel %vm372_vm2, %v839_v54, %v840_v17  ;;  %v895_v61 = vrot.slane %v802_v48, 4 }
 0x12c   :  { %4220 = vst [vmem:[#allocation22_spill] sm:$0xff] %v3365_v37  ;;  %v3371_v0 = vadd.f32 %v3335_v62, %v771_v27  ;;  %v538_v63 = vadd.f32 %v503_v46, %v481_v25  ;;  %v423_v14 = vadd.f32 %v390_v29, %v350_v7  ;;  %v951_v1 = vrot.slane %v3304_v19, 6  ;;  %v3395_v29 = vpop.f32.mrf.mxu1 }
 0x12d   :  { %v392_v9 = vrot.slane %v3358_v15, 2  ;;  %v3377_v32 = vmul.f32 %v985_v20, %v536_v34  ;;  %v3379_v59 = vmul.f32 %v985_v20, %v985_v20  ;;  %v3383_v2 = vmul.f32 %v3360_v56, %v3360_v56  ;;  %v3397_v56 = vpop.f32.mrf.mxu0 }
 0x12e   :  { %v352_v17 = vadd.f32 %v320_v43, %v3340_v38  ;;  %v3388_v52 = vmul.f32 %v3365_v37, %v3365_v37  ;;  %v504_v7 = vsel %vm486_vm3, %v502_v47, %v503_v46  ;;  %v874_v54 = vadd.f32 %v841_v41, %v802_v48 }
 0x12f   :  { %4221 = vst [vmem:[#allocation23_spill] sm:$0xff] %v3377_v32  ;;  %v772_v19 = vsel %vm299_vm1, %v770_v13, %v771_v27  ;;  %v987_v58 = vadd.f32 %v952_v35, %v931_v30  ;;  %v447_v34 = vsel %vm429_vm4, %v445_v33, %v446_v16  ;;  %v897_v20 = vsel %vm429_vm4, %v895_v61, %v896_v6 }
 0x130   :  { %v843_v25 = vrot.slane %v3371_v0, 2  ;;  %v3399_v43 = vmul.f32 %v538_v63, %v538_v63  ;;  %v480_v37 = vadd.f32 %v447_v34, %v423_v14  ;;  %v953_v32 = vsel %vm486_vm3, %v951_v1, %v952_v35  ;;  %v3421_v34 = vpop.f32.mrf.mxu0 }
 0x131   :  { %v426_v47 = vadd.f32 %v392_v9, %v3358_v15  ;;  %v449_v48 = vrot.slane %v3358_v15, 4  ;;  %v391_v30 = vrot.slane %v352_v17, 2  ;;  %v505_v16 = vrot.slane %v3340_v38, 6 }
 0x132   :  { %v804_v6 = vadd.f32 %v772_v19, %v3354_v12  ;;  %v930_v27 = vadd.f32 %v897_v20, %v874_v54  ;;  %v322_v46 = vrot.slane %v3373_v22, 1  ;;  %v774_v13 = vrot.slane %v3395_v29, 1  ;;  %v3419_v19 = vpop.f32.mrf.mxu1 }
 0x133   :  { %v321_v33 = vrot.slane %v3397_v56, 1  ;;  %v3409_v41 = vmul.f32 %v987_v58, %v538_v63  ;;  %v506_v35 = vrot.slane %v3320_v18, 6  ;;  %v877_v61 = vadd.f32 %v843_v25, %v3371_v0 }
 0x134   :  { %v899_v15 = vrot.slane %v3371_v0, 4  ;;  %v3414_v14 = vmul.f32 %v987_v58, %v987_v58  ;;  %v3416_v38 = vadd.f32 %v504_v7, %v480_v37  ;;  %v483_v1 = vadd.f32 %v449_v48, %v426_v47 }
 0x135   :  { %4222 = vst [vmem:[#allocation24_spill] sm:$0xff] %v3409_v41  ;;  %v955_v54 = vrot.slane %v3335_v62, 6  ;;  %v393_v63 = vsel %vm372_vm2, %v391_v30, %v392_v9  ;;  %v507_v20 = vsel %vm486_vm3, %v505_v16, %v506_v35  ;;  %v842_v18 = vrot.slane %v804_v6, 2 }
 0x136   :  { %4223 = vst [vmem:[#allocation25_spill] sm:$0xff] %v3416_v38  ;;  %v954_v41 = vrot.slane %v3354_v12, 6  ;;  %v3426_v24 = vadd.f32 %v953_v32, %v930_v27  ;;  %v3429_v0 = vadd.f32 %v3373_v22, %v322_v46  ;;  %v3432_v37 = vadd.f32 %v3395_v29, %v774_v13 }
 0x137   :  { %v323_v62 = vsel %vm299_vm1, %v321_v33, %v322_v46  ;;  %v933_v7 = vadd.f32 %v899_v15, %v877_v61  ;;  %v448_v58 = vrot.slane %v352_v17, 4  ;;  %v773_v47 = vrot.slane %v3419_v19, 1 }
 0x138   :  { %4224 = vst [vmem:[#allocation26_spill] sm:$0xff] %v3426_v24  ;;  %v1250_v9 = vrot.slane %v3421_v34, 1  ;;  %v3439_v30 = vmul.f32 %v3416_v38, %v3416_v38  ;;  %v540_v12 = vadd.f32 %v506_v35, %v483_v1  ;;  %v425_v32 = vadd.f32 %v393_v63, %v352_v17  ;;  %v3457_v63 = vpop.f32.mrf.mxu0 }
 0x139   :  { %v898_v16 = vrot.slane %v804_v6, 4  ;;  %v844_v27 = vsel %vm372_vm2, %v842_v18, %v843_v25  ;;  %v354_v11 = vadd.f32 %v323_v62, %v3397_v56  ;;  %v775_v51 = vsel %vm299_vm1, %v773_v47, %v774_v13 }
 0x13a   :  { %v3445_v46 = vadd.f32 %v3421_v34, %v1250_v9  ;;  %v3449_v33 = vmul.f32 %v3426_v24, %v3426_v24  ;;  %v956_v61 = vsel %vm486_vm3, %v954_v41, %v955_v54  ;;  %v395_v38 = vrot.slane %v3429_v0, 2  ;;  %v3462_v41 = vpop.f32.mrf.mxu1 }
 0x13b   :  { %v846_v17 = vrot.slane %v3432_v37, 2  ;;  %v989_v35 = vadd.f32 %v955_v54, %v933_v7  ;;  %v450_v25 = vsel %vm429_vm4, %v448_v58, %v449_v48  ;;  %v806_v1 = vadd.f32 %v775_v51, %v3419_v19 }
 0x13c   :  { %v1322_v13 = vrot.slane %v3445_v46, 2  ;;  %v3459_v18 = vmul.f32 %v540_v12, %v540_v12  ;;  %v482_v62 = vadd.f32 %v450_v25, %v425_v32  ;;  %v876_v47 = vadd.f32 %v844_v27, %v804_v6  ;;  %v3480_v50 = vpop.f32.mrf.mxu1 }
 0x13d   :  { %v509_v24 = vrot.slane %v3373_v22, 6  ;;  %v900_v39 = vsel %vm429_vm4, %v898_v16, %v899_v15  ;;  %v452_v54 = vrot.slane %v3429_v0, 4  ;;  %v958_v48 = vrot.slane %v3395_v29, 6 }
 0x13e   :  { %v394_v7 = vrot.slane %v354_v11, 2  ;;  %v428_v51 = vadd.f32 %v395_v38, %v3429_v0  ;;  %v879_v58 = vadd.f32 %v846_v17, %v3432_v37  ;;  %v902_v28 = vrot.slane %v3432_v37, 4 }
 0x13f   :  { %v1249_v32 = vrot.slane %v3457_v63, 1  ;;  %v3471_v6 = vmul.f32 %v989_v35, %v540_v12  ;;  %v3473_v22 = vmul.f32 %v989_v35, %v989_v35  ;;  %v845_v27 = vrot.slane %v806_v1, 2 }
 0x140   :  { %v1362_v15 = vadd.f32 %v1322_v13, %v3445_v46  ;;  %v3476_v16 = vadd.f32 %v507_v20, %v482_v62  ;;  %v932_v25 = vadd.f32 %v900_v39, %v876_v47  ;;  %v508_v29 = vrot.slane %v3397_v56, 6 }
 0x141   :  { %4225 = vst [vmem:[#allocation27_spill] sm:$0xff] %v3471_v6  ;;  %4226 = vst [vmem:[#allocation28_spill] sm:$0xff] %v3473_v22  ;;  %v1251_v0 = vsel %vm299_vm1, %v1249_v32, %v1250_v9  ;;  %v396_v37 = vsel %vm372_vm2, %v394_v7, %v395_v38  ;;  %v1378_v49 = vrot.slane %v3445_v46, 4  ;;  %v1715_v12 = vrot.slane %v3462_v41, 1  ;;  %v3486_v6 = vpop.f32.mrf.mxu0 }
 0x142   :  { %4227 = vst [vmem:[#allocation29_spill] sm:$0xff] %v3476_v16  ;;  %v1289_v35 = vadd.f32 %v1251_v0, %v3457_v63  ;;  %v485_v45 = vadd.f32 %v452_v54, %v428_v51  ;;  %v935_v20 = vadd.f32 %v902_v28, %v879_v58  ;;  %v451_v62 = vrot.slane %v354_v11, 4  ;;  %v3503_v58 = vpop.f32.mrf.mxu1 }
 0x143   :  { %v957_v39 = vrot.slane %v3419_v19, 6  ;;  %v847_v56 = vsel %vm372_vm2, %v845_v27, %v846_v17  ;;  %v1418_v9 = vadd.f32 %v1378_v49, %v1362_v15  ;;  %v1714_v32 = vrot.slane %v3480_v50, 1 }
 0x144   :  { %v1321_v47 = vrot.slane %v1289_v35, 2  ;;  %v3491_v38 = vadd.f32 %v956_v61, %v932_v25  ;;  %v427_v46 = vadd.f32 %v396_v37, %v354_v11  ;;  %v901_v7 = vrot.slane %v806_v1, 4 }
 0x145   :  { %v1253_v22 = vrot.slane %v3486_v6, 1  ;;  %v3496_v0 = vmul.f32 %v3476_v16, %v3476_v16  ;;  %v510_v51 = vsel %vm486_vm3, %v508_v29, %v509_v24  ;;  %v1434_v19 = vrot.slane %v3421_v34, 6 }
 0x146   :  { %4228 = vst [vmem:[#allocation30_spill] sm:$0xff] %v3491_v38  ;;  %v3501_v17 = vadd.f32 %v3462_v41, %v1715_v12  ;;  %v3505_v27 = vadd.f32 %v509_v24, %v485_v45  ;;  %v3507_v61 = vadd.f32 %v958_v48, %v935_v20  ;;  %v453_v11 = vsel %vm429_vm4, %v451_v62, %v452_v54  ;;  %v3521_v20 = vpop.f32.mrf.mxu0  ;;  %v3529_v62 = vpop.f32.mrf.mxu1 }
 0x147   :  { %4229 = vst [vmem:[#allocation31_spill] sm:$0xff] %v3496_v0  ;;  %v878_v15 = vadd.f32 %v847_v56, %v806_v1  ;;  %v1474_v25 = vadd.f32 %v1434_v19, %v1418_v9  ;;  %v1323_v37 = vsel %vm372_vm2, %v1321_v47, %v1322_v13  ;;  %v1716_v16 = vsel %vm299_vm1, %v1714_v32, %v1715_v12 }
 0x148   :  { %4230 = vst [vmem:[#allocation32_spill] sm:$0xff] %v3505_v27  ;;  %4231 = vst [vmem:[#allocation33_spill] sm:$0xff] %v3507_v61  ;;  %v3513_v29 = vadd.f32 %v3486_v6, %v1253_v22  ;;  %v3517_v34 = vmul.f32 %v3491_v38, %v3491_v38  ;;  %v484_v0 = vadd.f32 %v453_v11, %v427_v46  ;;  %v1787_v13 = vrot.slane %v3501_v17, 2 }
 0x149   :  { %v903_v45 = vsel %vm429_vm4, %v901_v7, %v902_v28  ;;  %v959_v24 = vsel %vm486_vm3, %v957_v39, %v958_v48  ;;  %v3525_v1 = vadd.f32 %v3154_v57, %v3129_v40  ;;  %v1377_v54 = vrot.slane %v1289_v35, 4 }
 0x14a   :  { %v1325_v12 = vrot.slane %v3513_v29, 2  ;;  %v3533_v56 = vmul.f32 %v3505_v27, %v3505_v27  ;;  %v3537_v28 = vmul.f32 %v3507_v61, %v3507_v61  ;;  %v1361_v48 = vadd.f32 %v1323_v37, %v1289_v35 }
 0x14b   :  { %4232 = vst [vmem:[#allocation34_spill] sm:$0xff] %v3525_v1  ;;  %v1754_v39 = vadd.f32 %v1716_v16, %v3480_v50  ;;  %v934_v40 = vadd.f32 %v903_v45, %v878_v15  ;;  %v2115_v57 = vsub.f32 %v1474_v25, %v3525_v1  ;;  %v1899_v9 = vrot.slane %v3462_v41, 6  ;;  %v3552_v25 = vpop.f32.mrf.mxu0 }
 0x14c   :  { %v1252_v47 = vrot.slane %v3521_v20, 1  ;;  %v3543_v32 = vadd.f32 %v510_v51, %v484_v0  ;;  %v1364_v46 = vadd.f32 %v1325_v12, %v3513_v29  ;;  %v1718_v7 = vrot.slane %v3503_v58, 1 }
 0x14d   :  { %v1717_v11 = vrot.slane %v3529_v62, 1  ;;  %v1827_v61 = vadd.f32 %v1787_v13, %v3501_v17  ;;  %v1843_v35 = vrot.slane %v3501_v17, 4  ;;  %v1379_v16 = vsel %vm429_vm4, %v1377_v54, %v1378_v49 }
 0x14e   :  { %4233 = vst [vmem:[#allocation35_spill] sm:$0xff] %v3543_v32  ;;  %v1433_v15 = vrot.slane %v3457_v63, 6  ;;  %v1417_v41 = vadd.f32 %v1379_v16, %v1361_v48  ;;  %v1786_v37 = vrot.slane %v1754_v39, 2  ;;  %v4197_v0 = vrot.slane %v3513_v29, 4  ;;  %v3593_v16 = vpop.f32.mrf.mxu0 }
 0x14f   :  { %v1254_v51 = vsel %vm299_vm1, %v1252_v47, %v1253_v22  ;;  %v3556_v45 = vadd.f32 %v959_v24, %v934_v40  ;;  %v2131_v27 = vmul.f32 1.0208334, %v2115_v57  ;;  %v1898_v38 = vrot.slane %v3480_v50, 6 }
 0x150   :  { %v3560_v1 = vadd.f32 %v1254_v51, %v3521_v20  ;;  %v1420_v49 = vadd.f32 %v4197_v0, %v1364_v46  ;;  %v3565_v63 = vadd.f32 %v3503_v58, %v1718_v7  ;;  %v1719_v17 = vsel %vm299_vm1, %v1717_v11, %v1718_v7  ;;  %v3581_v7 = vpop.f32.mrf.mxu1 }
 0x151   :  { %4234 = vst [vmem:[#allocation36_spill] sm:$0xff] %v3556_v45  ;;  %v1256_v54 = vrot.slane %v3552_v25, 1  ;;  %v3571_v22 = vmul.f32 %v3543_v32, %v3543_v32  ;;  %v1883_v24 = vadd.f32 %v1843_v35, %v1827_v61  ;;  %v1435_v50 = vsel %vm486_vm3, %v1433_v15, %v1434_v19 }
 0x152   :  { %v1437_v48 = vrot.slane %v3486_v6, 6  ;;  %v3575_v40 = vadd.f32 %v1435_v50, %v1417_v41  ;;  %v1788_v57 = vsel %vm372_vm2, %v1786_v37, %v1787_v13  ;;  %v1842_v47 = vrot.slane %v1754_v39, 4 }
 0x153   :  { %4235 = vst [vmem:[#allocation37_spill] sm:$0xff] %v3571_v22  ;;  %v3579_v46 = vadd.f32 %v3552_v25, %v1256_v54  ;;  %v3585_v11 = vmul.f32 %v3556_v45, %v3556_v45  ;;  %v3589_v61 = vadd.f32 %v3171_v4, %v3167_v3  ;;  %v1324_v6 = vrot.slane %v3560_v1, 2 }
 0x154   :  { %v1756_v19 = vadd.f32 %v1719_v17, %v3529_v62  ;;  %v3595_v13 = vadd.f32 0.0009, %v2131_v27  ;;  %v1900_v15 = vsel %vm486_vm3, %v1898_v38, %v1899_v9  ;;  %v1476_v41 = vadd.f32 %v1437_v48, %v1420_v49  ;;  %v3611_v49 = vpop.f32.mrf.mxu1 }
 0x155   :  { %4236 = vst [vmem:[#allocation38_spill] sm:$0xff] %v3585_v11  ;;  %v1790_v37 = vrot.slane %v3565_v63, 2  ;;  %v3599_v51 = vadd.f32 %v1899_v9, %v1883_v24  ;;  %v1826_v50 = vadd.f32 %v1788_v57, %v1754_v39  ;;  %v3603_v3 = vadd.f32 %v3218_v55, %v3187_v23 }
 0x156   :  { %v1328_v4 = vrot.slane %v3579_v46, 2  ;;  %v1844_v27 = vsel %vm429_vm4, %v1842_v47, %v1843_v35  ;;  %v1902_v0 = vrot.slane %v3503_v58, 6  ;;  %v1255_v38 = vrot.slane %v3593_v16, 1 }
 0x157   :  { %4237 = vst [vmem:[#allocation39_spill] sm:$0xff] %v3603_v3  ;;  %v1326_v9 = vsel %vm372_vm2, %v1324_v6, %v1325_v12  ;;  %v1436_v39 = vrot.slane %v3521_v20, 6  ;;  %v1789_v24 = vrot.slane %v1756_v19, 2  ;;  %v1721_v23 = vrot.slane %v3581_v7, 1  ;;  %v3623_v6 = vpop.f32.mrf.mxu0 }
 0x158   :  { %v2117_v55 = vsub.f32 %v1476_v41, %v3603_v3  ;;  %v1829_v57 = vadd.f32 %v1790_v37, %v3565_v63  ;;  %v1846_v17 = vrot.slane %v3565_v63, 4  ;;  %v1257_v35 = vsel %vm299_vm1, %v1255_v38, %v1256_v54 }
 0x159   :  { %v1882_v58 = vadd.f32 %v1844_v27, %v1826_v50  ;;  %v1901_v47 = vrot.slane %v3529_v62, 6  ;;  %v1366_v45 = vadd.f32 %v1328_v4, %v3579_v46  ;;  %v1720_v12 = vrot.slane %v3611_v49, 1 }
 0x15a   :  { %v1363_v20 = vadd.f32 %v1326_v9, %v3560_v1  ;;  %v1380_v32 = vrot.slane %v3560_v1, 4  ;;  %v3629_v41 = vadd.f32 %v3234_v8, %v3226_v44  ;;  %v1845_v63 = vrot.slane %v1756_v19, 4 }
 0x15b   :  { %v1791_v54 = vsel %vm372_vm2, %v1789_v24, %v1790_v37  ;;  %v1384_v50 = vrot.slane %v3579_v46, 4  ;;  %v3634_v62 = vadd.f32 %v3581_v7, %v1721_v23  ;;  %v1293_v27 = vadd.f32 %v1257_v35, %v3593_v16 }
 0x15c   :  { %v2133_v38 = vmul.f32 1.0208334, %v2117_v55  ;;  %v1885_v11 = vadd.f32 %v1846_v17, %v1829_v57  ;;  %v1438_v9 = vsel %vm486_vm3, %v1436_v39, %v1437_v48  ;;  %v1259_v1 = vrot.slane %v3623_v6, 1  ;;  %v3648_v57 = vpop.f32.mrf.mxu1 }
 0x15d   :  { %v3639_v22 = vadd.f32 %v1900_v15, %v1882_v58  ;;  %v1903_v44 = vsel %vm486_vm3, %v1901_v47, %v1902_v0  ;;  %v1422_v8 = vadd.f32 %v1384_v50, %v1366_v45  ;;  %v1722_v37 = vsel %vm299_vm1, %v1720_v12, %v1721_v23  ;;  %v3654_v45 = vpop.f32.mrf.mxu0 }
 0x15e   :  { %v4239_v46 = vrot.slane %v3513_v29, 4  ;;  %v1828_v3 = vadd.f32 %v1791_v54, %v1756_v19  ;;  %v1847_v35 = vsel %vm429_vm4, %v1845_v63, %v1846_v17  ;;  %v1440_v55 = vrot.slane %v3552_v25, 6 }
 0x15f   :  { %4238 = vst [vmem:[#allocation40_spill] sm:$0xff] %v3639_v22  ;;  %v1793_v15 = vrot.slane %v3634_v62, 2  ;;  %v1327_v39 = vrot.slane %v1293_v27, 2  ;;  %v3652_v58 = vadd.f32 %v3623_v6, %v1259_v1  ;;  %v3656_v23 = vadd.f32 0.0009, %v2133_v38 }
 0x160   :  { %v1382_v24 = vsel %vm429_vm4, %v1380_v32, %v4239_v46  ;;  %v3658_v29 = vadd.f32 %v1902_v0, %v1885_v11  ;;  %v3662_v32 = vadd.f32 %v3249_v21, %v3236_v10  ;;  %v1758_v25 = vadd.f32 %v1722_v37, %v3611_v49  ;;  %v3674_v10 = vpop.f32.mrf.mxu1 }
 0x161   :  { %v1419_v48 = vadd.f32 %v1382_v24, %v1363_v20  ;;  %4240 = vst [vmem:[#allocation41_spill] sm:$0xff] %v3656_v23  ;;  %v1478_v19 = vadd.f32 %v1440_v55, %v1422_v8  ;;  %v1905_v17 = vrot.slane %v3581_v7, 6  ;;  %v1331_v47 = vrot.slane %v3652_v58, 2  ;;  %v3681_v8 = vpop.f32.mrf.mxu0 }
 0x162   :  { %4241 = vst [vmem:[#allocation42_spill] sm:$0xff] %v3658_v29  ;;  %4242 = vst [vmem:[#allocation43_spill] sm:$0xff] %v3662_v32  ;;  %v1724_v12 = vrot.slane %v3648_v57, 1  ;;  %v1884_v20 = vadd.f32 %v1847_v35, %v1828_v3  ;;  %v1439_v63 = vrot.slane %v3593_v16, 6  ;;  %v3671_v0 = vadd.f32 %v3288_v5, %v3268_v42 }
 0x163   :  { %v1258_v11 = vrot.slane %v3654_v45, 1  ;;  %v3676_v21 = vadd.f32 %v1438_v9, %v1419_v48  ;;  %v1831_v54 = vadd.f32 %v1793_v15, %v3634_v62  ;;  %v1849_v7 = vrot.slane %v3634_v62, 4 }
 0x164   :  { %v1329_v38 = vsel %vm372_vm2, %v1327_v39, %v1328_v4  ;;  %v1383_v3 = vrot.slane %v1293_v27, 4  ;;  %v1792_v16 = vrot.slane %v1758_v25, 2  ;;  %v1368_v37 = vadd.f32 %v1331_v47, %v3652_v58 }
 0x165   :  { %v1260_v42 = vsel %vm299_vm1, %v1258_v11, %v1259_v1  ;;  %v2119_v5 = vsub.f32 %v1478_v19, %v3662_v32  ;;  %v3687_v46 = vadd.f32 %v3648_v57, %v1724_v12  ;;  %v1723_v24 = vrot.slane %v3674_v10, 1 }
 0x166   :  { %v1295_v9 = vadd.f32 %v1260_v42, %v3654_v45  ;;  %v1365_v62 = vadd.f32 %v1329_v38, %v1293_v27  ;;  %v1904_v4 = vrot.slane %v3611_v49, 6  ;;  %v1387_v35 = vrot.slane %v3652_v58, 4 }
 0x167   :  { %v1262_v48 = vrot.slane %v3681_v8, 1  ;;  %v3696_v1 = vadd.f32 %v1903_v44, %v1884_v20  ;;  %v1887_v19 = vadd.f32 %v1849_v7, %v1831_v54  ;;  %v1848_v11 = vrot.slane %v1758_v25, 4 }
 0x168   :  { %v1794_v32 = vsel %vm372_vm2, %v1792_v16, %v1793_v15  ;;  %v1424_v29 = vadd.f32 %v1387_v35, %v1368_v37  ;;  %v1330_v42 = vrot.slane %v1295_v9, 2  ;;  %v2135_v27 = vmul.f32 1.0208334, %v2119_v5  ;;  %v3708_v15 = vpop.f32.mrf.mxu1 }
 0x169   :  { %v3700_v23 = vadd.f32 %v3681_v8, %v1262_v48  ;;  %v1385_v49 = vsel %vm429_vm4, %v1383_v3, %v1384_v50  ;;  %v1796_v58 = vrot.slane %v3687_v46, 2  ;;  %v1725_v38 = vsel %vm299_vm1, %v1723_v24, %v1724_v12  ;;  %v3717_v3 = vpop.f32.mrf.mxu0 }
 0x16a   :  { %v1421_v22 = vadd.f32 %v1385_v49, %v1365_v62  ;;  %v1441_v44 = vsel %vm486_vm3, %v1439_v63, %v1440_v55  ;;  %v1906_v20 = vsel %vm486_vm3, %v1904_v4, %v1905_v17  ;;  %v1443_v54 = vrot.slane %v3623_v6, 6 }
 0x16b   :  { %v3710_v16 = vadd.f32 %v1905_v17, %v1887_v19  ;;  %v1830_v37 = vadd.f32 %v1794_v32, %v1758_v25  ;;  %v3714_v5 = vadd.f32 %v3306_v36, %v3294_v26  ;;  %v1334_v50 = vrot.slane %v3700_v23, 2 }
 0x16c   :  { %v1850_v12 = vsel %vm429_vm4, %v1848_v11, %v1849_v7  ;;  %v1480_v55 = vadd.f32 %v1443_v54, %v1424_v29  ;;  %v1332_v63 = vsel %vm372_vm2, %v1330_v42, %v1331_v47  ;;  %v1760_v6 = vadd.f32 %v1725_v38, %v3674_v10  ;;  %v3735_v11 = vpop.f32.mrf.mxu1 }
 0x16d   :  { %v3722_v24 = vadd.f32 0.0009, %v2135_v27  ;;  %v1833_v17 = vadd.f32 %v1796_v58, %v3687_v46  ;;  %v1852_v32 = vrot.slane %v3687_v46, 4  ;;  %v1727_v26 = vrot.slane %v3708_v15, 1  ;;  %v3737_v46 = vpop.f32.mrf.mxu0 }
 0x16e   :  { %v3727_v36 = vadd.f32 %v1441_v44, %v1421_v22  ;;  %v1908_v25 = vrot.slane %v3648_v57, 6  ;;  %v1386_v62 = vrot.slane %v1295_v9, 4  ;;  %v1261_v7 = vrot.slane %v3717_v3, 1 }
 0x16f   :  { %v1886_v29 = vadd.f32 %v1850_v12, %v1830_v37  ;;  %v1367_v4 = vadd.f32 %v1332_v63, %v1295_v9  ;;  %v1442_v47 = vrot.slane %v3654_v45, 6  ;;  %v1370_v19 = vadd.f32 %v1334_v50, %v3700_v23 }
 0x170   :  { %v2121_v22 = vsub.f32 %v1480_v55, %v3714_v5  ;;  %v3742_v57 = vadd.f32 %v3344_v31, %v3331_v60  ;;  %v1795_v42 = vrot.slane %v1760_v6, 2  ;;  %v1907_v27 = vrot.slane %v3674_v10, 6 }
 0x171   :  { %v1889_v9 = vadd.f32 %v1852_v32, %v1833_v17  ;;  %v4202_v45 = vrot.slane %v3700_v23, 4  ;;  %v3747_v49 = vadd.f32 %v3708_v15, %v1727_v26  ;;  %v1263_v38 = vsel %vm299_vm1, %v1261_v7, %v1262_v48  ;;  %v3759_v17 = vpop.f32.mrf.mxu1 }
 0x172   :  { %v1388_v44 = vsel %vm429_vm4, %v1386_v62, %v1387_v35  ;;  %v1851_v37 = vrot.slane %v1760_v6, 4  ;;  %v1726_v12 = vrot.slane %v3735_v11, 1  ;;  %v1265_v55 = vrot.slane %v3737_v46, 1 }
 0x173   :  { %v3755_v31 = vadd.f32 %v1906_v20, %v1886_v29  ;;  %v1423_v10 = vadd.f32 %v1388_v44, %v1367_v4  ;;  %v1426_v63 = vadd.f32 %v4202_v45, %v1370_v19  ;;  %v2137_v39 = vmul.f32 1.0208334, %v2121_v22  ;;  %v3770_v4 = vpop.f32.mrf.mxu0 }
 0x174   :  { %v1797_v48 = vsel %vm372_vm2, %v1795_v42, %v1796_v58  ;;  %v1297_v35 = vadd.f32 %v1263_v38, %v3717_v3  ;;  %v3764_v62 = vadd.f32 %v3737_v46, %v1265_v55  ;;  %v1444_v7 = vsel %vm486_vm3, %v1442_v47, %v1443_v54 }
 0x175   :  { %4243 = vst [vmem:[#allocation44_spill] sm:$0xff] %v3755_v31  ;;  %v1909_v60 = vsel %vm486_vm3, %v1907_v27, %v1908_v25  ;;  %v1446_v20 = vrot.slane %v3681_v8, 6  ;;  %v1799_v29 = vrot.slane %v3747_v49, 2  ;;  %v3772_v19 = vadd.f32 %v1908_v25, %v1889_v9  ;;  %v3783_v27 = vpop.f32.mrf.mxu1 }
 0x176   :  { %v1853_v22 = vsel %vm429_vm4, %v1851_v37, %v1852_v32  ;;  %v3777_v58 = vadd.f32 %v3379_v59, %v3350_v53  ;;  %v1728_v42 = vsel %vm299_vm1, %v1726_v12, %v1727_v26  ;;  %v3780_v38 = vadd.f32 %v1444_v7, %v1423_v10 }
 0x177   :  { %4244 = vst [vmem:[#allocation45_spill] sm:$0xff] %v3772_v19  ;;  %v1832_v54 = vadd.f32 %v1797_v48, %v1760_v6  ;;  %v1482_v47 = vadd.f32 %v1446_v20, %v1426_v63  ;;  %v1337_v8 = vrot.slane %v3764_v62, 2  ;;  %v3785_v44 = vadd.f32 0.0009, %v2137_v39 }
 0x178   :  { %4245 = vst [vmem:[#allocation46_spill] sm:$0xff] %v3777_v58  ;;  %v1911_v25 = vrot.slane %v3708_v15, 6  ;;  %v1333_v9 = vrot.slane %v1297_v35, 2  ;;  %v1264_v32 = vrot.slane %v3770_v4, 1  ;;  %v1835_v53 = vadd.f32 %v1799_v29, %v3747_v49 }
 0x179   :  { %v1855_v59 = vrot.slane %v3747_v49, 4  ;;  %v1445_v26 = vrot.slane %v3717_v3, 6  ;;  %v1762_v6 = vadd.f32 %v1728_v42, %v3735_v11  ;;  %v1372_v37 = vadd.f32 %v1337_v8, %v3764_v62  ;;  %v3804_v3 = vpop.f32.mrf.mxu0 }
 0x17a   :  { %v1730_v12 = vrot.slane %v3759_v17, 1  ;;  %v1266_v39 = vsel %vm299_vm1, %v1264_v32, %v1265_v55  ;;  %v1729_v10 = vrot.slane %v3783_v27, 1  ;;  %v1888_v63 = vadd.f32 %v1853_v22, %v1832_v54 }
 0x17b   :  { %v2123_v48 = vsub.f32 %v1482_v47, %v3777_v58  ;;  %v3802_v49 = vadd.f32 %v3388_v52, %v3383_v2  ;;  %v1335_v7 = vsel %vm372_vm2, %v1333_v9, %v1334_v50  ;;  %v1393_v55 = vrot.slane %v3764_v62, 4 }
 0x17c   :  { %v1299_v42 = vadd.f32 %v1266_v39, %v3770_v4  ;;  %v1731_v32 = vsel %vm299_vm1, %v1729_v10, %v1730_v12  ;;  %v1891_v15 = vadd.f32 %v1855_v59, %v1835_v53  ;;  %v1389_v22 = vrot.slane %v1297_v35, 4 }
 0x17d   :  { %v1798_v54 = vrot.slane %v1762_v6, 2  ;;  %v1910_v47 = vrot.slane %v3735_v11, 6  ;;  %v1447_v2 = vsel %vm486_vm3, %v1445_v26, %v1446_v20  ;;  %v1428_v52 = vadd.f32 %v1393_v55, %v1372_v37 }
 0x17e   :  { %v1765_v45 = vadd.f32 %v3759_v17, %v1730_v12  ;;  %v1268_v19 = vrot.slane %v3804_v3, 1  ;;  %v3816_v58 = vadd.f32 %v1909_v60, %v1888_v63  ;;  %v2139_v50 = vmul.f32 1.0208334, %v2123_v48 }
 0x17f   :  { %v1369_v62 = vadd.f32 %v1335_v7, %v1297_v35  ;;  %v1764_v9 = vadd.f32 %v1731_v32, %v3783_v27  ;;  %v1854_v39 = vrot.slane %v1762_v6, 4  ;;  %v1449_v53 = vrot.slane %v3737_v46, 6  ;;  %v3830_v35 = vpop.f32.mrf.mxu1 }
 0x180   :  { %v1336_v10 = vrot.slane %v1299_v42, 2  ;;  %v3821_v31 = vadd.f32 %v3804_v3, %v1268_v19  ;;  %v3823_v11 = vadd.f32 %v1911_v25, %v1891_v15  ;;  %v4247_v20 = vrot.slane %v3700_v23, 4  ;;  %v3837_v15 = vpop.f32.mrf.mxu0 }
 0x181   :  { %v1800_v60 = vsel %vm372_vm2, %v1798_v54, %v1799_v29  ;;  %v1912_v37 = vsel %vm486_vm3, %v1910_v47, %v1911_v25  ;;  %v1484_v12 = vadd.f32 %v1449_v53, %v1428_v52  ;;  %v3834_v46 = vadd.f32 %v3414_v14, %v3399_v43 }
 0x182   :  { %4246 = vst [vmem:[#allocation47_spill] sm:$0xff] %v3823_v11  ;;  %v1391_v26 = vsel %vm429_vm4, %v1389_v22, %v4247_v20  ;;  %v1802_v63 = vrot.slane %v1765_v45, 2  ;;  %v4204_v48 = vrot.slane %v3821_v31, 2  ;;  %v3839_v7 = vadd.f32 0.0009, %v2139_v50 }
 0x183   :  { %4248 = vst [vmem:[#allocation48_spill] sm:$0xff] %v3834_v46  ;;  %v1425_v23 = vadd.f32 %v1391_v26, %v1369_v62  ;;  %v1914_v32 = vrot.slane %v3759_v17, 6  ;;  %v1801_v29 = vrot.slane %v1764_v9, 2  ;;  %v1834_v22 = vadd.f32 %v1800_v60, %v1762_v6  ;;  %v3850_v62 = vpop.f32.mrf.mxu1 }
 0x184   :  { %v1856_v25 = vsel %vm429_vm4, %v1854_v39, %v1855_v59  ;;  %v1338_v54 = vsel %vm372_vm2, %v1336_v10, %v1337_v8  ;;  %v1374_v43 = vadd.f32 %v4204_v48, %v3821_v31  ;;  %v1858_v14 = vrot.slane %v1765_v45, 4  ;;  %v3854_v8 = vpop.f32.mrf.mxu0 }
 0x185   :  { %v1448_v47 = vrot.slane %v3770_v4, 6  ;;  %v1733_v52 = vrot.slane %v3830_v35, 1  ;;  %v1267_v50 = vrot.slane %v3837_v15, 1  ;;  %v2125_v17 = vsub.f32 %v1484_v12, %v3834_v46 }
 0x186   :  { %v1837_v6 = vadd.f32 %v1802_v63, %v1765_v45  ;;  %v1392_v20 = vrot.slane %v1299_v42, 4  ;;  %v4206_v59 = vrot.slane %v3821_v31, 4  ;;  %v1371_v39 = vadd.f32 %v1338_v54, %v1299_v42 }
 0x187   :  { %v1803_v10 = vsel %vm372_vm2, %v1801_v29, %v1802_v63  ;;  %v1857_v26 = vrot.slane %v1764_v9, 4  ;;  %v1269_v4 = vsel %vm299_vm1, %v1267_v50, %v1268_v19  ;;  %v3858_v60 = vadd.f32 %v1447_v2, %v1425_v23 }
 0x188   :  { %v1890_v48 = vadd.f32 %v1856_v25, %v1834_v22  ;;  %v1430_v11 = vadd.f32 %v4206_v59, %v1374_v43  ;;  %v1732_v12 = vrot.slane %v3850_v62, 1  ;;  %v1913_v45 = vrot.slane %v3783_v27, 6 }
 0x189   :  { %v3865_v46 = vadd.f32 %v3830_v35, %v1733_v52  ;;  %v1301_v42 = vadd.f32 %v1269_v4, %v3837_v15  ;;  %v1271_v63 = vrot.slane %v3854_v8, 1  ;;  %v1893_v29 = vadd.f32 %v1858_v14, %v1837_v6 }
 0x18a   :  { %v1394_v19 = vsel %vm429_vm4, %v1392_v20, %v1393_v55  ;;  %v1836_v2 = vadd.f32 %v1803_v10, %v1764_v9  ;;  %v1452_v23 = vrot.slane %v3804_v3, 6  ;;  %v2141_v22 = vmul.f32 1.0208334, %v2125_v17  ;;  %v3886_v20 = vpop.f32.mrf.mxu1 }
 0x18b   :  { %v1427_v25 = vadd.f32 %v1394_v19, %v1371_v39  ;;  %v1859_v54 = vsel %vm429_vm4, %v1857_v26, %v1858_v14  ;;  %v3873_v43 = vadd.f32 %v3854_v8, %v1271_v63  ;;  %v3879_v50 = vadd.f32 %v3449_v33, %v3439_v30  ;;  %v4249_v26 = vld [vmem:[#allocation28_spill] sm:$0xff]  ;;  %v3894_v33 = vpop.f32.mrf.mxu0 }
 0x18c   :  { %v1486_v6 = vadd.f32 %v1452_v23, %v1430_v11  ;;  %v1734_v55 = vsel %vm299_vm1, %v1732_v12, %v1733_v52  ;;  %v3882_v9 = vadd.f32 %v1912_v37, %v1890_v48  ;;  %v1450_v3 = vsel %vm486_vm3, %v1448_v47, %v1449_v53 }
 0x18d   :  { %v1805_v17 = vrot.slane %v3865_v46, 2  ;;  %v1339_v14 = vrot.slane %v1301_v42, 2  ;;  %v1892_v39 = vadd.f32 %v1859_v54, %v1836_v2  ;;  %v1915_v10 = vsel %vm486_vm3, %v1913_v45, %v1914_v32  ;;  %v4252_v54 = vld [vmem:[#allocation31_spill] sm:$0xff] }
 0x18e   :  { %v3891_v4 = vadd.f32 %v4249_v26, %v3459_v18  ;;  %v1343_v30 = vrot.slane %v3873_v43, 2  ;;  %v3896_v11 = vadd.f32 0.0009, %v2141_v22  ;;  %v3898_v37 = vadd.f32 %v1914_v32, %v1893_v29  ;;  %v3913_v22 = vpop.f32.mrf.mxu1 }
 0x18f   :  { %v3900_v53 = vadd.f32 %v1450_v3, %v1427_v25  ;;  %v1766_v48 = vadd.f32 %v1734_v55, %v3850_v62  ;;  %v1861_v52 = vrot.slane %v3865_v46, 4  ;;  %v1917_v12 = vrot.slane %v3830_v35, 6 }
 0x190   :  { %v2127_v47 = vsub.f32 %v1486_v6, %v3891_v4  ;;  %v1451_v18 = vrot.slane %v3837_v15, 6  ;;  %v1839_v45 = vadd.f32 %v1805_v17, %v3865_v46  ;;  %v4250_v19 = vrot.slane %v3821_v31, 2 }
 0x191   :  { %v1736_v32 = vrot.slane %v3886_v20, 1  ;;  %v1270_v29 = vrot.slane %v3894_v33, 1  ;;  %v3915_v25 = vadd.f32 %v1915_v10, %v1892_v39  ;;  %v3919_v6 = vadd.f32 %v3517_v34, %v4252_v54 }
 0x192   :  { %v1341_v2 = vsel %vm372_vm2, %v1339_v14, %v4250_v19  ;;  %v1916_v35 = vrot.slane %v3850_v62, 6  ;;  %v1376_v46 = vadd.f32 %v1343_v30, %v3873_v43  ;;  %v1395_v55 = vrot.slane %v1301_v42, 4 }
 0x193   :  { %4251 = vst [vmem:[#allocation28_spill] sm:$0xff] %v3915_v25  ;;  %v1804_v3 = vrot.slane %v1766_v48, 2  ;;  %v1272_v14 = vsel %vm299_vm1, %v1270_v29, %v1271_v63  ;;  %v1373_v26 = vadd.f32 %v1341_v2, %v1301_v42  ;;  %v1399_v19 = vrot.slane %v3873_v43, 4 }
 0x194   :  { %v1303_v39 = vadd.f32 %v1272_v14, %v3894_v33  ;;  %v1735_v10 = vrot.slane %v3913_v22, 1  ;;  %v2143_v34 = vmul.f32 1.0208334, %v2127_v47  ;;  %v1895_v54 = vadd.f32 %v1861_v52, %v1839_v45 }
 0x195   :  { %v1860_v27 = vrot.slane %v1766_v48, 4  ;;  %v3930_v62 = vadd.f32 %v3886_v20, %v1736_v32  ;;  %v1453_v59 = vsel %vm486_vm3, %v1451_v18, %v1452_v23  ;;  %v3934_v15 = vsel %vm486_vm3, %v1916_v35, %v1917_v12  ;;  %v4254_v35 = vld [vmem:[#allocation34_spill] sm:$0xff] }
 0x196   :  { %v1432_v25 = vadd.f32 %v1399_v19, %v1376_v46  ;;  %v1342_v63 = vrot.slane %v1303_v39, 2  ;;  %v4253_v42 = vrot.slane %v3821_v31, 4  ;;  %v1806_v2 = vsel %vm372_vm2, %v1804_v3, %v1805_v17 }
 0x197   :  { %v1455_v47 = vrot.slane %v3854_v8, 6  ;;  %v3943_v45 = vadd.f32 %v3537_v28, %v3533_v56  ;;  %v1737_v18 = vsel %vm299_vm1, %v1735_v10, %v1736_v32  ;;  %v2051_v46 = vadd.f32 0.0001, %v4254_v35 }
 0x198   :  { %v1397_v43 = vsel %vm429_vm4, %v1395_v55, %v4253_v42  ;;  %v1344_v23 = vsel %vm372_vm2, %v1342_v63, %v1343_v30  ;;  %v3948_v14 = vadd.f32 0.0009, %v2143_v34  ;;  %v3950_v31 = vadd.f32 %v1917_v12, %v1895_v54  ;;  %v4258_v63 = vld [vmem:[#allocation11_spill] sm:$0xff] }
 0x199   :  { %v1429_v29 = vadd.f32 %v1397_v43, %v1373_v26  ;;  %v1862_v55 = vsel %vm429_vm4, %v1860_v27, %v1861_v52  ;;  %v1808_v17 = vrot.slane %v3930_v62, 2  ;;  %v1838_v8 = vadd.f32 %v1806_v2, %v1766_v48  ;;  %v4256_v52 = vld [vmem:[#allocation9_spill] sm:$0xff]  ;;  %v4259_v2 = vld [vmem:[#allocation39_spill] sm:$0xff] }
 0x19a   :  { %v1488_v3 = vadd.f32 %v1455_v47, %v1432_v25  ;;  %v1398_v42 = vrot.slane %v1303_v39, 4  ;;  %v3955_v56 = vmul.f32 %v3595_v13, %v2051_v46  ;;  %v1864_v28 = vrot.slane %v3930_v62, 4 }
 0x19b   :  { %v1375_v30 = vadd.f32 %v1344_v23, %v1303_v39  ;;  %v1768_v32 = vadd.f32 %v1737_v18, %v3913_v22  ;;  %v4255_v26 = vsub.f32 %v3575_v40, %v3589_v61  ;;  %v3962_v10 = vadd.f32 %v1453_v59, %v1429_v29  ;;  %v4257_v59 = vld [vmem:[#allocation10_spill] sm:$0xff] }
 0x19c   :  { %v1920_v27 = vrot.slane %v3886_v20, 6  ;;  %v2067_v48 = vsub.f32 %v3599_v51, %v4256_v52  ;;  %2697 = vrcp.f32 %v3955_v56  ;;  %v1841_v13 = vadd.f32 %v1808_v17, %v3930_v62 }
 0x19d   :  { %v2130_v12 = vmul.f32 1.0208334, %v4255_v26  ;;  %v1454_v25 = vrot.slane %v3894_v33, 6  ;;  %v2050_v39 = vadd.f32 0.0001, %v3589_v61  ;;  %v2129_v54 = vsub.f32 %v1488_v3, %v3943_v45  ;;  %v4260_v61 = vld [vmem:[#allocation40_spill] sm:$0xff] }
 0x19e   :  { %v1400_v40 = vsel %vm429_vm4, %v1398_v42, %v1399_v19  ;;  %v1954_v43 = vmul.f32 %v4258_v63, %v4257_v59  ;;  %v2053_v29 = vadd.f32 0.0001, %v4259_v2  ;;  %v1807_v51 = vrot.slane %v1768_v32, 2  ;;  %v4261_v26 = vld [vmem:[#allocation41_spill] sm:$0xff] }
 0x19f   :  { %v2146_v34 = vadd.f32 0.0009, %v2130_v12  ;;  %v1431_v23 = vadd.f32 %v1400_v40, %v1375_v30  ;;  %v2019_v18 = vmul.f32 2.0, %v4256_v52  ;;  %v3979_v62 = vadd.f32 %v1862_v55, %v1838_v8  ;;  %v4262_v12 = vld [vmem:[#allocation37_spill] sm:$0xff]  ;;  %v4263_v30 = vld [vmem:[#allocation38_spill] sm:$0xff] }
 0x1a0   :  { %v2083_v33 = vmul.f32 2.0416667, %v2067_v48  ;;  %v2066_v46 = vsub.f32 %v4260_v61, %v1954_v43  ;;  %v3983_v3 = vmul.f32 %v4261_v26, %v2053_v29  ;;  %v2126_v19 = vsub.f32 %v3962_v10, %v3919_v6  ;;  %v4265_v61 = vld [vmem:[#allocation12_spill] sm:$0xff] }
 0x1a1   :  { %v3977_v35 = vmul.f32 %v2146_v34, %v2050_v39  ;;  %v1456_v42 = vsel %vm486_vm3, %v1454_v25, %v1455_v47  ;;  %v3990_v40 = vadd.f32 %v4263_v30, %v4262_v12  ;;  %v2145_v52 = vmul.f32 1.0208334, %v2129_v54  ;;  %v4266_v54 = vld [vmem:[#allocation42_spill] sm:$0xff]  ;;  %v4267_v30 = vld [vmem:[#allocation43_spill] sm:$0xff] }
 0x1a2   :  { %v3993_v55 = vadd.f32 %v1864_v28, %v1841_v13  ;;  %v1863_v8 = vrot.slane %v1768_v32, 4  ;;  %v1487_v48 = vadd.f32 %v1456_v42, %v1431_v23  ;;  %v1809_v39 = vsel %vm372_vm2, %v1807_v51, %v1808_v17  ;;  %v4268_v51 = vld [vmem:[#allocation13_spill] sm:$0xff] }
 0x1a3   :  { %2699 = vrcp.f32 %v3977_v35  ;;  %v2035_v34 = vadd.f32 0.0001, %v2019_v18  ;;  %v4264_v59 = vsub.f32 %v3676_v21, %v3629_v41  ;;  %v1919_v25 = vrot.slane %v3913_v22, 6  ;;  %v4269_v18 = vld [vmem:[#allocation14_spill] sm:$0xff] }
 0x1a4   :  { %2701 = vrcp.f32 %v3983_v3  ;;  %v2099_v63 = vadd.f32 0.0009, %v2083_v33  ;;  %v2018_v2 = vmul.f32 2.0, %v1954_v43  ;;  %v2082_v29 = vmul.f32 2.0416667, %v2066_v46 }
 0x1a5   :  { %v2132_v47 = vmul.f32 1.0208334, %v4264_v59  ;;  %v2069_v13 = vsub.f32 %v4266_v54, %v4265_v61  ;;  %v2052_v26 = vadd.f32 0.0001, %v3629_v41  ;;  %v2055_v23 = vadd.f32 0.0001, %v4267_v30 }
 0x1a6   :  { %v4005_v42 = vadd.f32 0.0009, %v2145_v52  ;;  %v4007_v17 = vadd.f32 %v1809_v39, %v1768_v32  ;;  %v4010_v21 = vsel %vm429_vm4, %v1863_v8, %v1864_v28  ;;  %v1956_v33 = vmul.f32 %v4269_v18, %v4268_v51 }
 0x1a7   :  { %v2148_v12 = vadd.f32 0.0009, %v2132_v47  ;;  %v2128_v43 = vsub.f32 %v1487_v48, %v3990_v40  ;;  %v2021_v46 = vmul.f32 2.0, %v4265_v61  ;;  %v4019_v41 = vmul.f32 %v3722_v24, %v2055_v23  ;;  %v4272_v23 = vld [vmem:[#allocation16_spill] sm:$0xff] }
 0x1a8   :  { %v2163_v52 = vmul.f32 %v2099_v63, %v2035_v34  ;;  %v2034_v47 = vadd.f32 0.0001, %v2018_v2  ;;  %v2068_v32 = vsub.f32 %v3696_v1, %v1956_v33  ;;  %v4270_v28 = vsub.f32 %v3727_v36, %v3671_v0 }
 0x1a9   :  { %v4016_v59 = vmul.f32 %v2148_v12, %v2052_v26  ;;  %v2698_v39 = vpop.eup %2697  ;;  %v2098_v54 = vadd.f32 0.0009, %v2082_v29  ;;  %v2085_v30 = vmul.f32 2.0416667, %v2069_v13  ;;  %v2057_v48 = vadd.f32 0.0001, %v3714_v5 }
 0x1aa   :  { %v2134_v8 = vmul.f32 1.0208334, %v4270_v28  ;;  %v2211_v61 = vmul.f32 %v2698_v39, %v3955_v56  ;;  %v2054_v24 = vadd.f32 0.0001, %v3671_v0  ;;  %v4030_v63 = vmul.f32 1.0208334, %v2128_v43 }
 0x1ab   :  { %2703 = vrcp.f32 %v4016_v59  ;;  %v2037_v1 = vadd.f32 0.0001, %v2021_v46  ;;  %v2020_v2 = vmul.f32 2.0, %v1956_v33  ;;  %v4033_v36 = vmul.f32 %v3785_v44, %v2057_v48  ;;  %v4271_v26 = vld [vmem:[#allocation15_spill] sm:$0xff]  ;;  %v4273_v0 = vld [vmem:[#allocation17_spill] sm:$0xff] }
 0x1ac   :  { %2705 = vrcp.f32 %v4019_v41  ;;  %v2150_v34 = vadd.f32 0.0009, %v2134_v8  ;;  %v2227_v29 = vsub.f32 2.0, %v2211_v61  ;;  %v2084_v13 = vmul.f32 2.0416667, %v2068_v32 }
 0x1ad   :  { %v2071_v5 = vsub.f32 %v3710_v16, %v4271_v26  ;;  %v2023_v56 = vmul.f32 2.0, %v4271_v26  ;;  %v1958_v51 = vmul.f32 %v4273_v0, %v4272_v23  ;;  %2707 = vrcp.f32 %v4033_v36 }
 0x1ae   :  { %v4037_v12 = vmul.f32 %v2150_v34, %v2054_v24  ;;  %v4274_v18 = vsub.f32 %v3780_v38, %v3742_v57  ;;  %v2243_v43 = vmul.f32 %v2698_v39, %v2227_v29  ;;  %v2162_v46 = vmul.f32 %v2098_v54, %v2034_v47 }
 0x1af   :  { %v2101_v32 = vadd.f32 0.0009, %v2085_v30  ;;  %v2036_v8 = vadd.f32 0.0001, %v2020_v2  ;;  %v2056_v48 = vadd.f32 0.0001, %v3742_v57 }
 0x1b0   :  { %v2136_v44 = vmul.f32 1.0208334, %v4274_v18  ;;  %v2700_v33 = vpop.eup %2699  ;;  %2709 = vrcp.f32 %v4037_v12  ;;  %v2259_v24 = vmul.f32 %v2243_v43, %v2163_v52  ;;  %v2100_v26 = vadd.f32 0.0009, %v2084_v13  ;;  %v4275_v30 = vld [vmem:[#allocation44_spill] sm:$0xff]  ;;  %v4277_v52 = vld [vmem:[#allocation18_spill] sm:$0xff] }
 0x1b1   :  { %v2702_v16 = vpop.eup %2701  ;;  %v2210_v28 = vmul.f32 %v2700_v33, %v3977_v35  ;;  %v2087_v23 = vmul.f32 2.0416667, %v2071_v5  ;;  %v2039_v0 = vadd.f32 0.0001, %v2023_v56  ;;  %v2022_v18 = vmul.f32 2.0, %v1958_v51  ;;  %v4276_v35 = vld [vmem:[#allocation46_spill] sm:$0xff] }
 0x1b2   :  { %v2152_v61 = vadd.f32 0.0009, %v2136_v44  ;;  %v2213_v34 = vmul.f32 %v2702_v16, %v3983_v3  ;;  %v2279_v47 = vsel %vm2278_vm5, %v2259_v24, 0.0  ;;  %v2070_v29 = vsub.f32 %v4275_v30, %v1958_v51  ;;  %v4278_v43 = vld [vmem:[#allocation45_spill] sm:$0xff]  ;;  %v4279_v24 = vld [vmem:[#allocation19_spill] sm:$0xff] }
 0x1b3   :  { %v2226_v38 = vsub.f32 2.0, %v2210_v28  ;;  %v2059_v2 = vadd.f32 0.0001, %v4276_v35  ;;  %2280 = vadd.xlane.f32.xlu0 %v2279_v47  ;;  %v2165_v44 = vmul.f32 %v2101_v32, %v2037_v1  ;;  %v2073_v3 = vsub.f32 %v4278_v43, %v4277_v52 }
 0x1b4   :  { %v4050_v39 = vmul.f32 %v2152_v61, %v2056_v48  ;;  %v2229_v54 = vsub.f32 2.0, %v2213_v34  ;;  %v2164_v5 = vmul.f32 %v2100_v26, %v2036_v8  ;;  %v2103_v56 = vadd.f32 0.0009, %v2087_v23  ;;  %v4280_v34 = vld [vmem:[#allocation20_spill] sm:$0xff] }
 0x1b5   :  { %v2242_v57 = vmul.f32 %v2700_v33, %v2226_v38  ;;  %v4059_v28 = vmul.f32 %v3839_v7, %v2059_v2  ;;  %v2038_v61 = vadd.f32 0.0001, %v2022_v18  ;;  %v2025_v51 = vmul.f32 2.0, %v4277_v52  ;;  %v4282_v2 = vld [vmem:[#allocation23_spill] sm:$0xff]  ;;  %v4284_v52 = vld [vmem:[#allocation48_spill] sm:$0xff] }
 0x1b6   :  { %2711 = vrcp.f32 %v4050_v39  ;;  %v2245_v13 = vmul.f32 %v2702_v16, %v2229_v54  ;;  %v1960_v47 = vmul.f32 %v4280_v34, %v4279_v24  ;;  %v2086_v32 = vmul.f32 2.0416667, %v2070_v29 }
 0x1b7   :  { %v2258_v48 = vmul.f32 %v2242_v57, %v2162_v46  ;;  %2713 = vrcp.f32 %v4059_v28  ;;  %v4281_v16 = vsub.f32 %v3858_v60, %v3802_v49  ;;  %v2089_v23 = vmul.f32 2.0416667, %v2073_v3  ;;  %v4283_v57 = vld [vmem:[#allocation47_spill] sm:$0xff] }
 0x1b8   :  { %v2704_v33 = vpop.eup %2703  ;;  %v2261_v1 = vmul.f32 %v2245_v13, %v2165_v44  ;;  %v2072_v38 = vsub.f32 %v3816_v58, %v1960_v47  ;;  %v2058_v30 = vadd.f32 0.0001, %v3802_v49  ;;  %v2167_v60 = vmul.f32 %v2103_v56, %v2039_v0 }
 0x1b9   :  { %v2138_v8 = vmul.f32 1.0208334, %v4281_v16  ;;  %v2706_v26 = vpop.eup %2705  ;;  %v2275_v7 = vsel %vm2274_vm6, %v2258_v48, 0.0  ;;  %v2212_v46 = vmul.f32 %v2704_v33, %v4016_v59  ;;  %v2075_v44 = vsub.f32 %v4283_v57, %v4282_v2 }
 0x1ba   :  { %2276 = vadd.xlane.f32.xlu0 %v2275_v7  ;;  %v2285_v18 = vsel %vm2278_vm5, %v2261_v1, 0.0  ;;  %v2215_v54 = vmul.f32 %v2706_v26, %v4019_v41  ;;  %v2061_v43 = vadd.f32 0.0001, %v4284_v52  ;;  %v2708_v59 = vpop.eup %2707  ;;  %v2102_v13 = vadd.f32 0.0009, %v2086_v32 }
 0x1bb   :  { %v2154_v29 = vadd.f32 0.0009, %v2138_v8  ;;  %2286 = vadd.xlane.f32.xlu1 %v2285_v18  ;;  %v2228_v35 = vsub.f32 2.0, %v2212_v46  ;;  %v2024_v58 = vmul.f32 2.0, %v1960_v47  ;;  %v2105_v41 = vadd.f32 0.0009, %v2089_v23 }
 0x1bc   :  { %v2231_v3 = vsub.f32 2.0, %v2215_v54  ;;  %v2217_v49 = vmul.f32 %v2708_v59, %v4033_v36  ;;  %v4081_v1 = vmul.f32 %v3896_v11, %v2061_v43  ;;  %v2088_v16 = vmul.f32 2.0416667, %v2072_v38  ;;  %v4285_v23 = vld [vmem:[#allocation21_spill] sm:$0xff]  ;;  %v4286_v18 = vld [vmem:[#allocation22_spill] sm:$0xff] }
 0x1bd   :  { %v4077_v48 = vmul.f32 %v2154_v29, %v2058_v30  ;;  %v2710_v24 = vpop.eup %2709  ;;  %v2244_v34 = vmul.f32 %v2704_v33, %v2228_v35  ;;  %v2091_v32 = vmul.f32 2.0416667, %v2075_v44  ;;  %v2166_v47 = vmul.f32 %v2102_v13, %v2038_v61 }
 0x1be   :  { %v2247_v0 = vmul.f32 %v2706_v26, %v2231_v3  ;;  %v2214_v56 = vmul.f32 %v2710_v24, %v4037_v12  ;;  %v2233_v7 = vsub.f32 2.0, %v2217_v49  ;;  %v2041_v33 = vadd.f32 0.0001, %v2025_v51 }
 0x1bf   :  { %2715 = vrcp.f32 %v4077_v48  ;;  %v2260_v8 = vmul.f32 %v2244_v34, %v2164_v5  ;;  %v1962_v36 = vmul.f32 %v4286_v18, %v4285_v23  ;;  %v2027_v12 = vmul.f32 2.0, %v4282_v2 }
 0x1c0   :  { %2717 = vrcp.f32 %v4081_v1  ;;  %v2230_v46 = vsub.f32 2.0, %v2214_v56  ;;  %v2263_v54 = vmul.f32 %v2247_v0, %v2167_v60  ;;  %v2249_v26 = vmul.f32 %v2708_v59, %v2233_v7  ;;  %v4288_v60 = vld [vmem:[#allocation24_spill] sm:$0xff] }
 0x1c1   :  { %v2282_v11 = vsel %vm2274_vm6, %v2260_v8, 0.0  ;;  %v2040_v5 = vadd.f32 0.0001, %v2024_v58  ;;  %v2074_v29 = vsub.f32 %v3882_v9, %v1962_v36  ;;  %v4287_v61 = vsub.f32 %v3900_v53, %v3879_v50 }
 0x1c2   :  { %2283 = vadd.xlane.f32.xlu1 %v2282_v11  ;;  %v2246_v30 = vmul.f32 %v2710_v24, %v2230_v46  ;;  %v2169_v51 = vmul.f32 %v2105_v41, %v2041_v33  ;;  %v2104_v57 = vadd.f32 0.0009, %v2088_v16  ;;  %v2107_v52 = vadd.f32 0.0009, %v2091_v32 }
 0x1c3   :  { %v2712_v38 = vpop.eup %2711  ;;  %v2140_v35 = vmul.f32 1.0208334, %v4287_v61  ;;  %v2077_v59 = vsub.f32 %v3898_v37, %v4288_v60  ;;  %v2060_v2 = vadd.f32 0.0001, %v3879_v50  ;;  %v2291_v58 = vsel %vm2278_vm5, %v2263_v54, 0.0 }
 0x1c4   :  { %v2216_v44 = vmul.f32 %v2712_v38, %v4050_v39  ;;  %v2262_v43 = vmul.f32 %v2246_v30, %v2166_v47  ;;  %v2714_v13 = vpop.eup %2713  ;;  %v2265_v9 = vmul.f32 %v2249_v26, %v2169_v51  ;;  %v2063_v53 = vadd.f32 0.0001, %v3891_v4 }
 0x1c5   :  { %v2156_v3 = vadd.f32 0.0009, %v2140_v35  ;;  %v2219_v39 = vmul.f32 %v2714_v13, %v4059_v28  ;;  %v2090_v41 = vmul.f32 2.0416667, %v2074_v29  ;;  %v2168_v37 = vmul.f32 %v2104_v57, %v2040_v5 }
 0x1c6   :  { %v2232_v24 = vsub.f32 2.0, %v2216_v44  ;;  %2292 = vadd.xlane.f32.xlu1 %v2291_v58  ;;  %v2288_v34 = vsel %vm2274_vm6, %v2262_v43, 0.0  ;;  %v2043_v50 = vadd.f32 0.0001, %v2027_v12  ;;  %v4105_v56 = vmul.f32 %v3948_v14, %v2063_v53 }
 0x1c7   :  { %v4102_v49 = vmul.f32 %v2156_v3, %v2060_v2  ;;  %2289 = vadd.xlane.f32.xlu0 %v2288_v34  ;;  %v2235_v16 = vsub.f32 2.0, %v2219_v39  ;;  %v2026_v8 = vmul.f32 2.0, %v1962_v36  ;;  %v2093_v7 = vmul.f32 2.0416667, %v2077_v59  ;;  %v4294_v39 = vld [vmem:[#allocation30_spill] sm:$0xff] }
 0x1c8   :  { %v2248_v0 = vmul.f32 %v2712_v38, %v2232_v24  ;;  %v2297_v4 = vsel %vm2278_vm5, %v2265_v9, 0.0  ;;  %v2142_v28 = vmul.f32 1.0208334, %v2126_v19  ;;  %v2160_v47 = vadd.f32 0.0009, %v4030_v63  ;;  %v4289_v19 = vld [vmem:[#allocation25_spill] sm:$0xff] }
 0x1c9   :  { %2719 = vrcp.f32 %v4102_v49  ;;  %v2171_v46 = vmul.f32 %v2107_v52, %v2043_v50  ;;  %v2251_v14 = vmul.f32 %v2714_v13, %v2235_v16  ;;  %v2106_v33 = vadd.f32 0.0009, %v2090_v41  ;;  %v4290_v38 = vld [vmem:[#allocation26_spill] sm:$0xff] }
 0x1ca   :  { %v2264_v32 = vmul.f32 %v2248_v0, %v2168_v37  ;;  %2721 = vrcp.f32 %v4105_v56  ;;  %2298 = vadd.xlane.f32.xlu1 %v2297_v4  ;;  %v2029_v36 = vmul.f32 2.0, %v4288_v60  ;;  %v2062_v11 = vadd.f32 0.0001, %v3919_v6  ;;  %v4291_v6 = vld [vmem:[#allocation28_spill] sm:$0xff]  ;;  %v4292_v60 = vld [vmem:[#allocation27_spill] sm:$0xff]  ;;  %v4296_v37 = vld [vmem:[#allocation33_spill] sm:$0xff] }
 0x1cb   :  { %v2158_v54 = vadd.f32 0.0009, %v2142_v28  ;;  %v2267_v12 = vmul.f32 %v2251_v14, %v2171_v46  ;;  %v1964_v63 = vmul.f32 %v4290_v38, %v4289_v19  ;;  %v2065_v30 = vadd.f32 0.0001, %v3943_v45  ;;  %v4297_v14 = vld [vmem:[#allocation35_spill] sm:$0xff] }
 0x1cc   :  { %v2716_v23 = vpop.eup %2715  ;;  %v2294_v18 = vsel %vm2274_vm6, %v2264_v32, 0.0  ;;  %v2042_v5 = vadd.f32 0.0001, %v2026_v8  ;;  %v2109_v29 = vadd.f32 0.0009, %v2093_v7  ;;  %v2079_v59 = vsub.f32 %v3950_v31, %v4292_v60 }
 0x1cd   :  { %v2718_v26 = vpop.eup %2717  ;;  %2295 = vadd.xlane.f32.xlu0 %v2294_v18  ;;  %v2218_v10 = vmul.f32 %v2716_v23, %v4077_v48  ;;  %v2190_v35 = vmul.f32 %v2158_v54, %v2062_v11  ;;  %v2303_v51 = vsel %vm2278_vm5, %v2267_v12, 0.0  ;;  %v2076_v44 = vsub.f32 %v4291_v6, %v1964_v63 }
 0x1ce   :  { %v2221_v61 = vmul.f32 %v2718_v26, %v4081_v1  ;;  %v2193_v52 = vmul.f32 %v4005_v42, %v2065_v30  ;;  %2304 = vadd.xlane.f32.xlu1 %v2303_v51  ;;  %v2045_v43 = vadd.f32 0.0001, %v2029_v36  ;;  %v2170_v45 = vmul.f32 %v2106_v33, %v2042_v5  ;;  %v4298_v33 = vld [vmem:[#allocation36_spill] sm:$0xff] }
 0x1cf   :  { %v2234_v57 = vsub.f32 2.0, %v2218_v10  ;;  %2723 = vrcp.f32 %v2190_v35  ;;  %v2064_v1 = vadd.f32 0.0001, %v3990_v40  ;;  %v1950_v3 = vadd.f32 %v3934_v15, %v3979_v62  ;;  %v4293_v62 = vld [vmem:[#allocation29_spill] sm:$0xff] }
 0x1d0   :  { %v2237_v48 = vsub.f32 2.0, %v2221_v61  ;;  %2725 = vrcp.f32 %v2193_v52  ;;  %v1953_v13 = vadd.f32 %v1920_v27, %v3993_v55  ;;  %v2173_v42 = vmul.f32 %v2109_v29, %v2045_v43  ;;  %v4295_v55 = vld [vmem:[#allocation32_spill] sm:$0xff] }
 0x1d1   :  { %v2250_v2 = vmul.f32 %v2716_v23, %v2234_v57  ;;  %v1896_v9 = vadd.f32 %v4010_v21, %v4007_v17  ;;  %v2092_v31 = vmul.f32 2.0416667, %v2076_v44  ;;  %v2192_v53 = vmul.f32 %v2160_v47, %v2064_v1 }
 0x1d2   :  { %v2253_v58 = vmul.f32 %v2718_v26, %v2237_v48  ;;  %v1921_v40 = vsel %vm486_vm3, %v1919_v25, %v1920_v27  ;;  %v2095_v15 = vmul.f32 2.0416667, %v2079_v59  ;;  %v1966_v41 = vmul.f32 %v4294_v39, %v4293_v62 }
 0x1d3   :  { %v2266_v24 = vmul.f32 %v2250_v2, %v2170_v45  ;;  %v1969_v0 = vmul.f32 %v4296_v37, %v4295_v55  ;;  %v2028_v17 = vmul.f32 2.0, %v1964_v63  ;;  %2727 = vrcp.f32 %v2192_v53 }
 0x1d4   :  { %v2269_v34 = vmul.f32 %v2253_v58, %v2173_v42  ;;  %v2031_v22 = vmul.f32 2.0, %v4292_v60  ;;  %v2078_v16 = vsub.f32 %v1950_v3, %v1966_v41  ;;  %v1952_v25 = vadd.f32 %v1921_v40, %v1896_v9 }
 0x1d5   :  { %v2300_v50 = vsel %vm2274_vm6, %v2266_v24, 0.0  ;;  %v2108_v8 = vadd.f32 0.0009, %v2092_v31  ;;  %v2081_v4 = vsub.f32 %v1953_v13, %v1969_v0  ;;  %v2111_v32 = vadd.f32 0.0009, %v2095_v15 }
 0x1d6   :  { %v2720_v21 = vpop.eup %2719  ;;  %2301 = vadd.xlane.f32.xlu0 %v2300_v50  ;;  %v2309_v20 = vsel %vm2278_vm5, %v2269_v34, 0.0  ;;  %v2044_v47 = vadd.f32 0.0001, %v2028_v17  ;;  %v1968_v23 = vmul.f32 %v4298_v33, %v4297_v14  ;;  %v2047_v18 = vadd.f32 0.0001, %v2031_v22 }
 0x1d7   :  { %v2722_v27 = vpop.eup %2721  ;;  %2310 = vadd.xlane.f32.xlu1 %v2309_v20  ;;  %v2220_v7 = vmul.f32 %v2720_v21, %v4102_v49  ;;  %v2094_v11 = vmul.f32 2.0416667, %v2078_v16  ;;  %v2097_v12 = vmul.f32 2.0416667, %v2081_v4  ;;  %v2030_v63 = vmul.f32 2.0, %v1966_v41 }
 0x1d8   :  { %v2223_v28 = vmul.f32 %v2722_v27, %v4105_v56  ;;  %v2172_v54 = vmul.f32 %v2108_v8, %v2044_v47  ;;  %v2080_v10 = vsub.f32 %v1952_v25, %v1968_v23  ;;  %v2175_v19 = vmul.f32 %v2111_v32, %v2047_v18 }
 0x1d9   :  { %v2236_v46 = vsub.f32 2.0, %v2220_v7  ;;  %v2033_v5 = vmul.f32 2.0, %v1969_v0  ;;  %v2110_v61 = vadd.f32 0.0009, %v2094_v11  ;;  %v2113_v6 = vadd.f32 0.0009, %v2097_v12 }
 0x1da   :  { %v2239_v36 = vsub.f32 2.0, %v2223_v28  ;;  %v2096_v43 = vmul.f32 2.0416667, %v2080_v10  ;;  %v2046_v60 = vadd.f32 0.0001, %v2030_v63  ;;  %v2032_v1 = vmul.f32 2.0, %v1968_v23 }
 0x1db   :  { %v2252_v26 = vmul.f32 %v2720_v21, %v2236_v46  ;;  %v2049_v45 = vadd.f32 0.0001, %v2033_v5 }
 0x1dc   :  { %v2255_v38 = vmul.f32 %v2722_v27, %v2239_v36  ;;  %v2724_v49 = vpop.eup %2723  ;;  %v2174_v13 = vmul.f32 %v2110_v61, %v2046_v60  ;;  %v2340_v27 = vlaneseq }
 0x1dd   :  { %v2268_v30 = vmul.f32 %v2252_v26, %v2172_v54  ;;  %v2726_v29 = vpop.eup %2725  ;;  %v2222_v51 = vmul.f32 %v2724_v49, %v2190_v35  ;;  %v2177_v58 = vmul.f32 %v2113_v6, %v2049_v45  ;;  %v2112_v35 = vadd.f32 0.0009, %v2096_v43 }
 0x1de   :  { %v2271_v56 = vmul.f32 %v2255_v38, %v2175_v19  ;;  %v2225_v44 = vmul.f32 %v2726_v29, %v2193_v52  ;;  %v2048_v52 = vadd.f32 0.0001, %v2032_v1  ;;  %v2341_v8 = vand.u32 127, %v2340_v27 }
 0x1df   :  { %v2306_v57 = vsel %vm2274_vm6, %v2268_v30, 0.0  ;;  %v2238_v59 = vsub.f32 2.0, %v2222_v51  ;;  %v2343_v32 = vshrl.u32 %v2340_v27, 7 }
 0x1e0   :  { %2307 = vadd.xlane.f32.xlu0 %v2306_v57  ;;  %v2315_v48 = vsel %vm2278_vm5, %v2271_v56, 0.0  ;;  %v2241_v2 = vsub.f32 2.0, %v2225_v44  ;;  %v2728_v3 = vpop.eup %2727  ;;  %v2176_v39 = vmul.f32 %v2112_v35, %v2048_v52  ;;  %v2346_v28 = vadd.s32 4294967288, %v2341_v8 }
 0x1e1   :  { %2316 = vadd.xlane.f32.xlu1 %v2315_v48  ;;  %v2254_v42 = vmul.f32 %v2724_v49, %v2238_v59  ;;  %v2224_v24 = vmul.f32 %v2728_v3, %v2192_v53  ;;  %v2344_v47 = vsub.s32 %v2341_v8, %v2343_v32 }
 0x1e2   :  { %v2257_v9 = vmul.f32 %v2726_v29, %v2241_v2  ;;  %v2349_v14 = vsub.s32 %v2346_v28, %v2343_v32 }
 0x1e3   :  { %v2270_v31 = vmul.f32 %v2254_v42, %v2174_v13  ;;  %v2240_v34 = vsub.f32 2.0, %v2224_v24 }
 0x1e4   :  { %v2273_v40 = vmul.f32 %v2257_v9, %v2177_v58 }
 0x1e5   :  { %v2312_v15 = vsel %vm2274_vm6, %v2270_v31, 0.0  ;;  %v2256_v41 = vmul.f32 %v2728_v3, %v2240_v34 }
 0x1e6   :  { %2313 = vadd.xlane.f32.xlu0 %v2312_v15  ;;  %v2321_v62 = vsel %vm2278_vm5, %v2273_v40, 0.0 }
 0x1e7   :  { %2322 = vadd.xlane.f32.xlu1 %v2321_v62  ;;  %v2272_v55 = vmul.f32 %v2256_v41, %v2176_v39 }
 0x1e9   :  { %v2318_v37 = vsel %vm2274_vm6, %v2272_v55, 0.0 }
 0x1ea   :  { %2319 = vadd.xlane.f32.xlu0 %v2318_v37 }
 0x23c   :  { %v2281_v17 = vpop.xlane.xlu0 %2280 }
 0x23d   :  { %v2350_v38 = vrot.slane %v2281_v17, %v2349_v14 }
 0x243   :  { %v2277_v21 = vpop.xlane.xlu0 %2276 }
 0x244   :  { %v2287_v0 = vpop.xlane.xlu1 %2286  ;;  %v2345_v11 = vrot.slane %v2277_v21, %v2344_v47 }
 0x245   :  { %v2360_v54 = vrot.slane %v2287_v0, %v2349_v14 }
 0x246   :  { %v2352_v57 = vsel %vm2351_vm7, %v2350_v38, %v2345_v11 }
 0x24b   :  { %v2284_v50 = vpop.xlane.xlu1 %2283 }
 0x24c   :  { %v2356_v23 = vrot.slane %v2284_v50, %v2344_v47 }
 0x24e   :  { %v2361_v63 = vsel %vm2351_vm7, %v2360_v54, %v2356_v23 }
 0x24f   :  { %v2293_v53 = vpop.xlane.xlu1 %2292  ;;  %v2417_v44 = vsel %vm2416_vm8, %v2361_v63, %v2352_v57 }
 0x250   :  { %v2290_v20 = vpop.xlane.xlu0 %2289  ;;  %v2369_v18 = vrot.slane %v2293_v53, %v2349_v14 }
 0x251   :  { %v2365_v36 = vrot.slane %v2290_v20, %v2344_v47 }
 0x253   :  { %v2299_v22 = vpop.xlane.xlu1 %2298  ;;  %v2370_v29 = vsel %vm2351_vm7, %v2369_v18, %v2365_v36 }
 0x254   :  { %v2378_v26 = vrot.slane %v2299_v22, %v2349_v14  ;;  %v2419_v48 = vsel %vm2418_vm9, %v2370_v29, %v2417_v44 }
 0x256   :  { %v2296_v16 = vpop.xlane.xlu0 %2295 }
 0x257   :  { %v2305_v25 = vpop.xlane.xlu1 %2304  ;;  %v2374_v12 = vrot.slane %v2296_v16, %v2344_v47 }
 0x258   :  { %v2387_v10 = vrot.slane %v2305_v25, %v2349_v14 }
 0x259   :  { %v2379_v6 = vsel %vm2351_vm7, %v2378_v26, %v2374_v12 }
 0x25a   :  { %v2421_v45 = vsel %vm2420_vm10, %v2379_v6, %v2419_v48 }
 0x25f   :  { %v2302_v7 = vpop.xlane.xlu0 %2301 }
 0x260   :  { %v2311_v4 = vpop.xlane.xlu1 %2310  ;;  %v2383_v19 = vrot.slane %v2302_v7, %v2344_v47 }
 0x261   :  { %v2396_v49 = vrot.slane %v2311_v4, %v2349_v14 }
 0x262   :  { %v2388_v43 = vsel %vm2351_vm7, %v2387_v10, %v2383_v19 }
 0x263   :  { %v2423_v3 = vsel %vm2422_vm11, %v2388_v43, %v2421_v45 }
 0x269   :  { %v2308_v46 = vpop.xlane.xlu0 %2307 }
 0x26a   :  { %v2317_v33 = vpop.xlane.xlu1 %2316  ;;  %v2392_v30 = vrot.slane %v2308_v46, %v2344_v47 }
 0x26b   :  { %v2405_v56 = vrot.slane %v2317_v33, %v2349_v14 }
 0x26c   :  { %v2397_v60 = vsel %vm2351_vm7, %v2396_v49, %v2392_v30 }
 0x26d   :  { %v2425_v42 = vsel %vm2424_vm12, %v2397_v60, %v2423_v3 }
 0x26f   :  { %v2314_v5 = vpop.xlane.xlu0 %2313 }
 0x270   :  { %v2401_v61 = vrot.slane %v2314_v5, %v2344_v47  ;;  %v2323_v51 = vpop.xlane.xlu1 %2322 }
 0x271   :  { %v2414_v59 = vrot.slane %v2323_v51, %v2349_v14 }
 0x272   :  { %v2406_v2 = vsel %vm2351_vm7, %v2405_v56, %v2401_v61 }
 0x273   :  { %v2320_v1 = vpop.xlane.xlu0 %2319  ;;  %v2427_v9 = vsel %vm2426_vm13, %v2406_v2, %v2425_v42 }
 0x274   :  { %v2410_v13 = vrot.slane %v2320_v1, %v2344_v47 }
 0x276   :  { %v2415_v58 = vsel %vm2351_vm7, %v2414_v59, %v2410_v13 }
 0x277   :  { %v2429_v35 = vsel %vm2428_vm14, %v2415_v58, %v2427_v9 }
 0x278   :  { %v2431_v24 = vsel %vm2274_vm6, %v2429_v35, 0.0 }
 0x279   :  { %2432 = vadd.xlane.f32.xlu0 %v2431_v24 }
 0x302   :  { %v2433_v31 = vpop.xlane.xlu0 %2432 }
 0x303   :  { %v2435_v40 = vmul.f32 0.01, %v2433_v31 }
 0x305   :  { %2437 = vst.msk [vmem:[%s4172_s3] sm:$0xff] %vm2436_vm15, %v2435_v40 }
 0x306   :  { %2442 = vsyncpa [#allocation3], 1 }
 0x307   :  { %2443 = vsyncpa [#allocation5], 1 }

</bundles_post_ra>
